<compile_context>
chip_gen: v5e
topology: v5e:2x2
jax: 0.10.0
libtpu: 0.0.40
codegen_flags: <defaults>
</compile_context>

<pallas_src>
import jax
import jax.numpy as jnp
from jax.experimental import pallas as pl
from jax.experimental.pallas import tpu as pltpu

C_IN, C_MID1, C_MID2, C_OUT = 512, 256, 128, 1
MAX_TILE_PIX = 1024  # pixels (lanes) per grid step; sweep 512-2048 if tuning


def _netd_pixel_kernel(x_ref, w1_ref, w2_ref, w3_ref, o_ref):
    # x_ref : (1, 512, T) f32   -- channels x pixels for one image slice
    # w1_ref: (256, 512)  bf16
    # w2_ref: (128, 256)  bf16
    # w3_ref: (128, 1)    f32
    # o_ref : (1, 1, T)
    x = x_ref[0].astype(jnp.bfloat16)                                   # (512, T)
    h1 = jnp.dot(w1_ref[...], x, preferred_element_type=jnp.float32)    # (256, T)
    h1 = jnp.maximum(h1, 0.0).astype(jnp.bfloat16)                      # relu(conv1)
    h2 = jnp.dot(w2_ref[...], h1, preferred_element_type=jnp.float32)   # (128, T)
    h2 = jnp.maximum(h2, 0.0)                                           # relu(conv2)
    # conv3: 1 output channel -> elementwise multiply + cross-sublane reduce
    # (VPU/XLU slots; avoids wasting MXU columns), result is lane-dense.
    logits = jnp.sum(h2 * w3_ref[...], axis=0, keepdims=True)           # (1, T)
    o_ref[0] = jax.nn.sigmoid(logits).astype(o_ref.dtype)               # sigmoid(conv3)


@jax.jit
def netd_pixel_forward(x_nchw, w1, w2, w3):
    """x_nchw: (N, 512, H, W); w_k are PyTorch-style (C_out, C_in, 1, 1)."""
    N, C, H, W = x_nchw.shape
    assert C == C_IN
    HW = H * W

    # Free reshape: NCHW is already laid out as (N, C, H*W) in memory, so the
    # kernel reads the activation straight from HBM exactly once.
    x3 = x_nchw.reshape(N, C_IN, HW)

    # Conv weights (C_out, C_in, 1, 1) -> left-matmul weights (C_out, C_in).
    w1m = w1.reshape(C_MID1, C_IN).astype(jnp.bfloat16)                   # (256, 512)
    w2m = w2.reshape(C_MID2, C_MID1).astype(jnp.bfloat16)                 # (128, 256)
    w3m = jnp.transpose(w3.reshape(C_OUT, C_MID2)).astype(jnp.float32)    # (128, 1)

    # Pixel tile: multiple of 128 lanes (or the full extent when HW < 128).
    if HW >= 128:
        tile_pix = min(MAX_TILE_PIX, (HW // 128) * 128)
    else:
        tile_pix = HW
    num_tiles = (HW + tile_pix - 1) // tile_pix  # partial tail tile is masked

    out3 = pl.pallas_call(
        _netd_pixel_kernel,
        out_shape=jax.ShapeDtypeStruct((N, C_OUT, HW), x_nchw.dtype),
        grid_spec=pltpu.PrefetchScalarGridSpec(
            num_scalar_prefetch=0,
            grid=(N, num_tiles),
            in_specs=[
                pl.BlockSpec((1, C_IN, tile_pix), lambda n, t: (n, 0, t)),
                pl.BlockSpec((C_MID1, C_IN), lambda n, t: (0, 0)),
                pl.BlockSpec((C_MID2, C_MID1), lambda n, t: (0, 0)),
                pl.BlockSpec((C_MID2, C_OUT), lambda n, t: (0, 0)),
            ],
            out_specs=pl.BlockSpec((1, C_OUT, tile_pix), lambda n, t: (n, 0, t)),
        ),
        compiler_params=pltpu.CompilerParams(
            dimension_semantics=("parallel", "parallel")),
    )(x3, w1m, w2m, w3m)

    # (N, 1, H*W) -> (N, 1, H, W): free reshape.
    return out3.reshape(N, C_OUT, H, W)


def _reference_forward(x_nchw, w1, w2, w3):
    """Pure-JAX f32 reference (same math as the PyTorch module)."""
    x2d = jnp.transpose(x_nchw, (0, 2, 3, 1)).reshape(-1, C_IN)
    h = jax.nn.relu(x2d @ jnp.transpose(w1.reshape(C_MID1, C_IN)))
    h = jax.nn.relu(h @ jnp.transpose(w2.reshape(C_MID2, C_MID1)))
    o = jax.nn.sigmoid(h @ jnp.transpose(w3.reshape(C_OUT, C_MID2)))
    N, _, H, W = x_nchw.shape
    return jnp.transpose(o.reshape(N, H, W, C_OUT), (0, 3, 1, 2))


if __name__ == "__main__":
    key = jax.random.PRNGKey(0)
    k_x, k_w1, k_w2, k_w3 = jax.random.split(key, 4)

    # Small spatial size; channel dims are fixed by the module (512->256->128->1).
    N, H, W = 2, 16, 16
    x = jax.random.normal(k_x, (N, C_IN, H, W), dtype=jnp.float32)

    # Deterministic normal_init(mean=0, std=0.01), PyTorch conv weight layout.
    w1 = 0.01 * jax.random.normal(k_w1, (C_MID1, C_IN, 1, 1), dtype=jnp.float32)
    w2 = 0.01 * jax.random.normal(k_w2, (C_MID2, C_MID1, 1, 1), dtype=jnp.float32)
    w3 = 0.01 * jax.random.normal(k_w3, (C_OUT, C_MID2, 1, 1), dtype=jnp.float32)

    out = netd_pixel_forward(x, w1, w2, w3)
    jax.block_until_ready(out)

    ref = _reference_forward(x, w1, w2, w3)
    assert out.shape == (N, 1, H, W)
    # bf16 MXU path with f32 accumulation: loosen the pure-f32 1e-5 tolerance.
    max_err = float(jnp.max(jnp.abs(out - ref)))
    assert max_err < 5e-3, f"max abs err {max_err}"

    print("KERNEL_OK")
</pallas_src>

<mosaic_0001>
module attributes {stable_mosaic.version = 11 : i64} {
  func.func @_netd_pixel_kernel(%arg0: i32, %arg1: i32, %arg2: memref<1x512x256xf32, #tpu.memory_space<vmem>>, %arg3: memref<256x512xbf16, #tpu.memory_space<vmem>>, %arg4: memref<128x256xbf16, #tpu.memory_space<vmem>>, %arg5: memref<128x1xf32, #tpu.memory_space<vmem>>, %arg6: memref<1x1x256xf32, #tpu.memory_space<vmem>>) attributes {dimension_semantics = [#tpu.dimension_semantics<parallel>, #tpu.dimension_semantics<parallel>], iteration_bounds = array<i64: 2, 1>, scalar_prefetch = 0 : i64, scratch_operands = 0 : i64, tpu.core_type = #tpu.core_type<tc>, window_params = [{transform_indices = @transform_0, window_bounds = array<i64: 1, 512, 256>}, {pipeline_mode = #tpu.pipeline_mode<synchronous>, transform_indices = @transform_1, window_bounds = array<i64: 256, 512>}, {pipeline_mode = #tpu.pipeline_mode<synchronous>, transform_indices = @transform_2, window_bounds = array<i64: 128, 256>}, {pipeline_mode = #tpu.pipeline_mode<synchronous>, transform_indices = @transform_3, window_bounds = array<i64: 128, 1>}, {transform_indices = @transform_4, window_bounds = array<i64: 1, 1, 256>}]} {
    %c0 = arith.constant 0 : index
    %c0_0 = arith.constant 0 : index
    %c0_1 = arith.constant 0 : index
    %0 = vector.load %arg2[%c0, %c0_0, %c0_1] : memref<1x512x256xf32, #tpu.memory_space<vmem>>, vector<1x512x256xf32>
    %1 = vector.shape_cast %0 : vector<1x512x256xf32> to vector<512x256xf32>
    %2 = arith.truncf %1 : vector<512x256xf32> to vector<512x256xbf16>
    %c0_2 = arith.constant 0 : index
    %c0_3 = arith.constant 0 : index
    %3 = vector.load %arg3[%c0_2, %c0_3] : memref<256x512xbf16, #tpu.memory_space<vmem>>, vector<256x512xbf16>
    %cst = arith.constant dense<0.000000e+00> : vector<256x256xf32>
    %4 = tpu.matmul %3, %2, %cst {dimension_numbers = #tpu.dot_dimension_numbers<[1], [0], [0], [1], [0, 0, 1, 1], [], []>} : vector<256x512xbf16>, vector<512x256xbf16>, vector<256x256xf32> -> vector<256x256xf32>
    %cst_4 = arith.constant 0.000000e+00 : f32
    %5 = vector.broadcast %cst_4 : f32 to vector<256x256xf32>
    %6 = arith.maximumf %4, %5 : vector<256x256xf32>
    %7 = arith.truncf %6 : vector<256x256xf32> to vector<256x256xbf16>
    %c0_5 = arith.constant 0 : index
    %c0_6 = arith.constant 0 : index
    %8 = vector.load %arg4[%c0_5, %c0_6] : memref<128x256xbf16, #tpu.memory_space<vmem>>, vector<128x256xbf16>
    %cst_7 = arith.constant dense<0.000000e+00> : vector<128x256xf32>
    %9 = tpu.matmul %8, %7, %cst_7 {dimension_numbers = #tpu.dot_dimension_numbers<[1], [0], [0], [1], [0, 0, 1, 1], [], []>} : vector<128x256xbf16>, vector<256x256xbf16>, vector<128x256xf32> -> vector<128x256xf32>
    %cst_8 = arith.constant 0.000000e+00 : f32
    %10 = vector.broadcast %cst_8 : f32 to vector<128x256xf32>
    %11 = arith.maximumf %9, %10 : vector<128x256xf32>
    %c0_9 = arith.constant 0 : index
    %c0_10 = arith.constant 0 : index
    %12 = vector.load %arg5[%c0_9, %c0_10] : memref<128x1xf32, #tpu.memory_space<vmem>>, vector<128x1xf32>
    %13 = vector.broadcast %12 : vector<128x1xf32> to vector<128x256xf32>
    %14 = arith.mulf %11, %13 : vector<128x256xf32>
    %cst_11 = arith.constant dense<0.000000e+00> : vector<256xf32>
    %15 = vector.multi_reduction <add>, %14, %cst_11 [0] : vector<128x256xf32> to vector<256xf32>
    %16 = vector.shape_cast %15 : vector<256xf32> to vector<1x256xf32>
    %17 = arith.negf %16 : vector<1x256xf32>
    %18 = math.exp %17 : vector<1x256xf32>
    %cst_12 = arith.constant 1.000000e+00 : f32
    %19 = vector.broadcast %cst_12 : f32 to vector<1x256xf32>
    %20 = arith.addf %19, %18 : vector<1x256xf32>
    %21 = arith.divf %19, %20 : vector<1x256xf32>
    %c0_13 = arith.constant 0 : index
    %c0_14 = arith.constant 0 : index
    %c0_15 = arith.constant 0 : index
    %22 = vector.load %arg6[%c0_13, %c0_14, %c0_15] : memref<1x1x256xf32, #tpu.memory_space<vmem>>, vector<1x1x256xf32>
    %23 = vector.shape_cast %22 : vector<1x1x256xf32> to vector<1x256xf32>
    %24 = vector.shape_cast %21 : vector<1x256xf32> to vector<1x1x256xf32>
    tpu.vector_store %arg6[%c0_13, %c0_14, %c0_15], %24 {strides = array<i32>} : memref<1x1x256xf32, #tpu.memory_space<vmem>>, vector<1x1x256xf32>,
    return
  }
  func.func @transform_0(%arg0: i32, %arg1: i32) -> (i32, i32, i32) {
    %c0_i32 = arith.constant 0 : i32
    %c0_i32_0 = arith.constant 0 : i32
    return %arg0, %c0_i32, %arg1 : i32, i32, i32
  }
  func.func @transform_1(%arg0: i32, %arg1: i32) -> (i32, i32) {
    %c0_i32 = arith.constant 0 : i32
    %c0_i32_0 = arith.constant 0 : i32
    %c0_i32_1 = arith.constant 0 : i32
    return %c0_i32, %c0_i32_0 : i32, i32
  }
  func.func @transform_2(%arg0: i32, %arg1: i32) -> (i32, i32) {
    %c0_i32 = arith.constant 0 : i32
    %c0_i32_0 = arith.constant 0 : i32
    %c0_i32_1 = arith.constant 0 : i32
    return %c0_i32, %c0_i32_0 : i32, i32
  }
  func.func @transform_3(%arg0: i32, %arg1: i32) -> (i32, i32) {
    %c0_i32 = arith.constant 0 : i32
    %c0_i32_0 = arith.constant 0 : i32
    %c0_i32_1 = arith.constant 0 : i32
    return %c0_i32, %c0_i32_0 : i32, i32
  }
  func.func @transform_4(%arg0: i32, %arg1: i32) -> (i32, i32, i32) {
    %c0_i32 = arith.constant 0 : i32
    %c0_i32_0 = arith.constant 0 : i32
    return %arg0, %c0_i32, %arg1 : i32, i32, i32
  }
}

</mosaic_0001>

<bundles_post_ra>
// kernel: netd_pixel_forward.1
= control target key start
LH: loop header
LB: loop body
LE: loop exit
PB: predicated region body
PF: predicated region fallthrough
CT: control target
= control target key end

     0   :  { %s2742_s15 = smov 0   ;;  %s2744_s16 = smov 0   ;;  %s3977_s0 = inlined_call_operand.vmem [shape: f32[2,512,256], index: 0, kind: input, shape index: {}]   ;;  %s3978_s1 = inlined_call_operand.vmem [shape: bf16[256,512], index: 1, kind: input, shape index: {}]   ;;  %s3979_s2 = inlined_call_operand.vmem [shape: bf16[128,256], index: 2, kind: input, shape index: {}]   ;;  %s3980_s3 = inlined_call_operand.vmem [shape: f32[128,1], index: 3, kind: input, shape index: {}]   ;;  %s3981_s4 = inlined_call_operand.vmem [shape: f32[2,1,256], index: 4, kind: output, shape index: {}]  }
   0x1   :  { %s2746_s17 = smov 0  }
   0x2 LB: > { %s26_s18 = sadd.s32 1, %s2710_s16  ;;  %p2247_p0 = scmp.ge.s32.totalorder %s2714_s17, 1  ;;  %s2714_s17 = sphi %s2746_s17, %s14_s17   ;;  %s2710_s16 = sphi %s2744_s16, %s4120_s16   ;;  %s2706_s15 = sphi %s2742_s15, %s4119_s15  }
   0x3   : > { %p28_p1 = scmp.ge.s32.totalorder %s26_s18, 2  ;;  %p183_p2 = scmp.lt.s32.totalorder %s2714_s17, 3 }
   0x5   : > { %s4122_s18 = smov (%p28_p1, %s26_s18), 0  ;;  %p184_p3 = pnand %p2247_p0, %p183_p2 }
   0x7   : > { %187 = sbr.rel (%p184_p3) target bundleno = 1032 (0x408), region = 36 }
   0xc   : > { %p217_p4 = scmp.lt.s32.totalorder %s2706_s15, 1  ;;  %vm2154_vm8 = vcmask 1040384  }
   0xe   : > { %s4124_s15 = smov (!%p217_p4, %s2706_s15), 1 }
   0xf   : > { %s2575_s19 = sshll.u32 %s4124_s15, 10  ;;  %s2250_s7 = sshll.u32 %s4124_s15, 1 }
  0x10   : > { %s2766_s22 = scalar_lea.vmem %s3977_s0, %s2575_s19  ;;  %s233_s10 = scalar_lea.vmem %s3981_s4, %s2250_s7 }
  0x11   : > { %v263_v0 = vld [vmem:[%s2766_s22 + $0xe0] sm:$0xff]  ;;  %v265_v1 = vld [vmem:[%s2766_s22 + $0xf0] sm:$0xff] }
  0x12   : > { %v295_v2 = vld [vmem:[%s2766_s22 + $0x1e0] sm:$0xff]  ;;  %v377_v3 = vpack.c.bf16 %v265_v1, %v263_v0  ;;  %v297_v4 = vld [vmem:[%s2766_s22 + $0x1f0] sm:$0xff] }
  0x13   : > { %v327_v5 = vld [vmem:[%s2766_s22 + $0x2e0] sm:$0xff]  ;;  %v329_v6 = vld [vmem:[%s2766_s22 + $0x2f0] sm:$0xff]  ;;  %v393_v7 = vpack.c.bf16 %v297_v4, %v295_v2 }
  0x14   : > { %v409_v8 = vpack.c.bf16 %v329_v6, %v327_v5  ;;  %v359_v9 = vld [vmem:[%s2766_s22 + $0x3e0] sm:$0xff]  ;;  %v361_v10 = vld [vmem:[%s2766_s22 + $0x3f0] sm:$0xff]  ;;  %811 = vmatpush.bf16.msra.mxu0 %v377_v3 }
  0x15   : > { %v259_v11 = vld [vmem:[%s2766_s22 + $0xc0] sm:$0xff]  ;;  %v425_v12 = vpack.c.bf16 %v361_v10, %v359_v9  ;;  %v261_v13 = vld [vmem:[%s2766_s22 + $0xd0] sm:$0xff]  ;;  %900 = vmatpush.bf16.msra.mxu1 %v393_v7 }
  0x16   : > { %v291_v14 = vld [vmem:[%s2766_s22 + $0x1c0] sm:$0xff]  ;;  %v293_v15 = vld [vmem:[%s2766_s22 + $0x1d0] sm:$0xff]  ;;  %989 = vmatpush.bf16.msra.mxu2 %v409_v8  ;;  %v375_v16 = vpack.c.bf16 %v261_v13, %v259_v11 }
  0x17   : > { %v391_v17 = vpack.c.bf16 %v293_v15, %v291_v14  ;;  %v323_v18 = vld [vmem:[%s2766_s22 + $0x2c0] sm:$0xff]  ;;  %v325_v19 = vld [vmem:[%s2766_s22 + $0x2d0] sm:$0xff]  ;;  %1078 = vmatpush.bf16.msra.mxu3 %v425_v12 }
  0x18   : > { %v355_v20 = vld [vmem:[%s2766_s22 + $0x3c0] sm:$0xff]  ;;  %v407_v21 = vpack.c.bf16 %v325_v19, %v323_v18  ;;  %v357_v22 = vld [vmem:[%s2766_s22 + $0x3d0] sm:$0xff]  ;;  %812 = vmatpush.bf16.msra.mxu0 %v375_v16 }
  0x19   : > { %v255_v23 = vld [vmem:[%s2766_s22 + $0xa0] sm:$0xff]  ;;  %v257_v24 = vld [vmem:[%s2766_s22 + $0xb0] sm:$0xff]  ;;  %v423_v25 = vpack.c.bf16 %v357_v22, %v355_v20  ;;  %901 = vmatpush.bf16.msra.mxu1 %v391_v17 }
  0x1a   : > { %v287_v26 = vld [vmem:[%s2766_s22 + $0x1a0] sm:$0xff]  ;;  %v289_v27 = vld [vmem:[%s2766_s22 + $0x1b0] sm:$0xff]  ;;  %v373_v29 = vpack.c.bf16 %v257_v24, %v255_v23  ;;  %990 = vmatpush.bf16.msra.mxu2 %v407_v21 }
  0x1b   : > { %v319_v28 = vld [vmem:[%s2766_s22 + $0x2a0] sm:$0xff]  ;;  %v321_v30 = vld [vmem:[%s2766_s22 + $0x2b0] sm:$0xff]  ;;  %v389_v33 = vpack.c.bf16 %v289_v27, %v287_v26  ;;  %1079 = vmatpush.bf16.msra.mxu3 %v423_v25 }
  0x1c   : > { %v351_v31 = vld [vmem:[%s2766_s22 + $0x3a0] sm:$0xff]  ;;  %v353_v32 = vld [vmem:[%s2766_s22 + $0x3b0] sm:$0xff]  ;;  %v405_v34 = vpack.c.bf16 %v321_v30, %v319_v28  ;;  %813 = vmatpush.bf16.msra.mxu0 %v373_v29 }
  0x1d   : > { %v251_v35 = vld [vmem:[%s2766_s22 + $0x80] sm:$0xff]  ;;  %v253_v36 = vld [vmem:[%s2766_s22 + $0x90] sm:$0xff]  ;;  %v421_v38 = vpack.c.bf16 %v353_v32, %v351_v31  ;;  %902 = vmatpush.bf16.msra.mxu1 %v389_v33 }
  0x1e   : > { %v283_v37 = vld [vmem:[%s2766_s22 + $0x180] sm:$0xff]  ;;  %v285_v39 = vld [vmem:[%s2766_s22 + $0x190] sm:$0xff]  ;;  %v371_v44 = vpack.c.bf16 %v253_v36, %v251_v35  ;;  %991 = vmatpush.bf16.msra.mxu2 %v405_v34  ;;  %v2261_v35 = vld [vmem:[%s3978_s1 + $0x8] sm:$0xf] }
  0x1f   : > { %v315_v40 = vld [vmem:[%s2766_s22 + $0x280] sm:$0xff]  ;;  %v317_v41 = vld [vmem:[%s2766_s22 + $0x290] sm:$0xff]  ;;  %v387_v45 = vpack.c.bf16 %v285_v39, %v283_v37  ;;  %1080 = vmatpush.bf16.msra.mxu3 %v421_v38  ;;  %v2579_v36 = vld [vmem:[%s3978_s1 + $0x14] sm:$0xf0] }
  0x20   : > { %v347_v42 = vld [vmem:[%s2766_s22 + $0x380] sm:$0xff]  ;;  %v349_v43 = vld [vmem:[%s2766_s22 + $0x390] sm:$0xff]  ;;  %v403_v46 = vpack.c.bf16 %v317_v41, %v315_v40  ;;  %814 = vmatpush.bf16.msra.mxu0 %v371_v44  ;;  %v2577_v38 = vld [vmem:[%s3978_s1 + $0xc] sm:$0xf] }
  0x21   : > { %v247_v47 = vld [vmem:[%s2766_s22 + $0x60] sm:$0xff]  ;;  %v249_v48 = vld [vmem:[%s2766_s22 + $0x70] sm:$0xff]  ;;  %v419_v50 = vpack.c.bf16 %v349_v43, %v347_v42  ;;  %903 = vmatpush.bf16.msra.mxu1 %v387_v45  ;;  %v2263_v39 = vld [vmem:[%s3978_s1 + $0x18] sm:$0xf0]  ;;  %v2860_v42 = vor.u32 %v2579_v36, %v2261_v35 }
  0x22   : > { %v279_v49 = vld [vmem:[%s2766_s22 + $0x160] sm:$0xff]  ;;  %v281_v51 = vld [vmem:[%s2766_s22 + $0x170] sm:$0xff]  ;;  %v369_v56 = vpack.c.bf16 %v249_v48, %v247_v47  ;;  %992 = vmatpush.bf16.msra.mxu2 %v403_v46  ;;  %v2862_v43 = vor.u32 %v2577_v38, %v2263_v39  ;;  %v2277_v48 = vld [vmem:[%s3978_s1 + $0x28] sm:$0xf] }
  0x23   : > { %v311_v52 = vld [vmem:[%s2766_s22 + $0x260] sm:$0xff]  ;;  %v313_v53 = vld [vmem:[%s2766_s22 + $0x270] sm:$0xff]  ;;  %v385_v57 = vpack.c.bf16 %v281_v51, %v279_v49  ;;  %1081 = vmatpush.bf16.msra.mxu3 %v419_v50  ;;  %v2583_v49 = vld [vmem:[%s3978_s1 + $0x34] sm:$0xf0] }
  0x24   : > { %v343_v54 = vld [vmem:[%s2766_s22 + $0x360] sm:$0xff]  ;;  %v345_v55 = vld [vmem:[%s2766_s22 + $0x370] sm:$0xff]  ;;  %v401_v58 = vpack.c.bf16 %v313_v53, %v311_v52  ;;  %815 = vmatpush.bf16.msra.mxu0 %v369_v56  ;;  %v2581_v50 = vld [vmem:[%s3978_s1 + $0x2c] sm:$0xf] }
  0x25   : > { %v243_v59 = vld [vmem:[%s2766_s22 + $0x40] sm:$0xff]  ;;  %v245_v60 = vld [vmem:[%s2766_s22 + $0x50] sm:$0xff]  ;;  %v417_v62 = vpack.c.bf16 %v345_v55, %v343_v54  ;;  %904 = vmatpush.bf16.msra.mxu1 %v385_v57  ;;  %v2279_v51 = vld [vmem:[%s3978_s1 + $0x38] sm:$0xf0]  ;;  %v2896_v54 = vor.u32 %v2583_v49, %v2277_v48 }
  0x26   : > { %v275_v61 = vld [vmem:[%s2766_s22 + $0x140] sm:$0xff]  ;;  %v277_v63 = vld [vmem:[%s2766_s22 + $0x150] sm:$0xff]  ;;  %v367_v4 = vpack.c.bf16 %v245_v60, %v243_v59  ;;  %993 = vmatpush.bf16.msra.mxu2 %v401_v58  ;;  %v2898_v55 = vor.u32 %v2581_v50, %v2279_v51  ;;  %v2293_v60 = vld [vmem:[%s3978_s1 + $0x48] sm:$0xf] }
  0x27   : > { %v307_v0 = vld [vmem:[%s2766_s22 + $0x240] sm:$0xff]  ;;  %v309_v1 = vld [vmem:[%s2766_s22 + $0x250] sm:$0xff]  ;;  %v383_v5 = vpack.c.bf16 %v277_v63, %v275_v61  ;;  %1082 = vmatpush.bf16.msra.mxu3 %v417_v62  ;;  %v2587_v61 = vld [vmem:[%s3978_s1 + $0x54] sm:$0xf0] }
  0x28   : > { %v339_v2 = vld [vmem:[%s2766_s22 + $0x340] sm:$0xff]  ;;  %v341_v3 = vld [vmem:[%s2766_s22 + $0x350] sm:$0xff]  ;;  %v399_v6 = vpack.c.bf16 %v309_v1, %v307_v0  ;;  %816 = vmatpush.bf16.msra.mxu0 %v367_v4  ;;  %v2585_v62 = vld [vmem:[%s3978_s1 + $0x4c] sm:$0xf] }
  0x29   : > { %v239_v7 = vld [vmem:[%s2766_s22 + $0x20] sm:$0xff]  ;;  %v241_v8 = vld [vmem:[%s2766_s22 + $0x30] sm:$0xff]  ;;  %v415_v10 = vpack.c.bf16 %v341_v3, %v339_v2  ;;  %905 = vmatpush.bf16.msra.mxu1 %v383_v5  ;;  %v2295_v63 = vld [vmem:[%s3978_s1 + $0x58] sm:$0xf0]  ;;  %v2932_v2 = vor.u32 %v2587_v61, %v2293_v60 }
  0x2a   : > { %v271_v9 = vld [vmem:[%s2766_s22 + $0x120] sm:$0xff]  ;;  %v273_v11 = vld [vmem:[%s2766_s22 + $0x130] sm:$0xff]  ;;  %v365_v16 = vpack.c.bf16 %v241_v8, %v239_v7  ;;  %994 = vmatpush.bf16.msra.mxu2 %v399_v6  ;;  %v2934_v3 = vor.u32 %v2585_v62, %v2295_v63  ;;  %v2309_v8 = vld [vmem:[%s3978_s1 + $0x68] sm:$0xf] }
  0x2b   : > { %v303_v12 = vld [vmem:[%s2766_s22 + $0x220] sm:$0xff]  ;;  %v305_v13 = vld [vmem:[%s2766_s22 + $0x230] sm:$0xff]  ;;  %v381_v17 = vpack.c.bf16 %v273_v11, %v271_v9  ;;  %1083 = vmatpush.bf16.msra.mxu3 %v415_v10  ;;  %v2591_v9 = vld [vmem:[%s3978_s1 + $0x74] sm:$0xf0] }
  0x2c   : > { %v335_v14 = vld [vmem:[%s2766_s22 + $0x320] sm:$0xff]  ;;  %v337_v15 = vld [vmem:[%s2766_s22 + $0x330] sm:$0xff]  ;;  %v397_v18 = vpack.c.bf16 %v305_v13, %v303_v12  ;;  %817 = vmatpush.bf16.msra.mxu0 %v365_v16  ;;  %v2589_v10 = vld [vmem:[%s3978_s1 + $0x6c] sm:$0xf] }
  0x2d   : > { %v235_v19 = vld [vmem:[%s2766_s22] sm:$0xff]  ;;  %v237_v20 = vld [vmem:[%s2766_s22 + $0x10] sm:$0xff]  ;;  %v413_v22 = vpack.c.bf16 %v337_v15, %v335_v14  ;;  %906 = vmatpush.bf16.msra.mxu1 %v381_v17  ;;  %v2311_v11 = vld [vmem:[%s3978_s1 + $0x78] sm:$0xf0]  ;;  %v2968_v14 = vor.u32 %v2591_v9, %v2309_v8 }
  0x2e   : > { %v267_v21 = vld [vmem:[%s2766_s22 + $0x100] sm:$0xff]  ;;  %v269_v23 = vld [vmem:[%s2766_s22 + $0x110] sm:$0xff]  ;;  %v363_v28 = vpack.c.bf16 %v237_v20, %v235_v19  ;;  %995 = vmatpush.bf16.msra.mxu2 %v397_v18  ;;  %v2970_v15 = vor.u32 %v2589_v10, %v2311_v11  ;;  %v2325_v20 = vld [vmem:[%s3978_s1 + $0x88] sm:$0xf] }
  0x2f   : > { %v299_v24 = vld [vmem:[%s2766_s22 + $0x200] sm:$0xff]  ;;  %v301_v25 = vld [vmem:[%s2766_s22 + $0x210] sm:$0xff]  ;;  %v379_v32 = vpack.c.bf16 %v269_v23, %v267_v21  ;;  %1084 = vmatpush.bf16.msra.mxu3 %v413_v22  ;;  %v2595_v21 = vld [vmem:[%s3978_s1 + $0x94] sm:$0xf0] }
  0x30   : > { %v331_v26 = vld [vmem:[%s2766_s22 + $0x300] sm:$0xff]  ;;  %v333_v27 = vld [vmem:[%s2766_s22 + $0x310] sm:$0xff]  ;;  %v395_v33 = vpack.c.bf16 %v301_v25, %v299_v24  ;;  %818 = vmatpush.bf16.msra.mxu0 %v363_v28  ;;  %v2593_v22 = vld [vmem:[%s3978_s1 + $0x8c] sm:$0xf] }
  0x31   : > { %v2253_v29 = vld [vmem:[%s3978_s1] sm:$0xf]  ;;  %v2578_v30 = vld [vmem:[%s3978_s1 + $0xc] sm:$0xf0]  ;;  %v2576_v31 = vld [vmem:[%s3978_s1 + $0x4] sm:$0xf]  ;;  %v411_v37 = vpack.c.bf16 %v333_v27, %v331_v26  ;;  %907 = vmatpush.bf16.msra.mxu1 %v379_v32  ;;  %v3004_v26 = vor.u32 %v2595_v21, %v2325_v20 }
  0x32   : > { %v2255_v34 = vld [vmem:[%s3978_s1 + $0x10] sm:$0xf0]  ;;  %v2856_v40 = vor.u32 %v2578_v30, %v2253_v29  ;;  %996 = vmatpush.bf16.msra.mxu2 %v395_v33  ;;  %v2269_v44 = vld [vmem:[%s3978_s1 + $0x20] sm:$0xf]  ;;  %v2582_v45 = vld [vmem:[%s3978_s1 + $0x2c] sm:$0xf0] }
  0x33   : > { %v2858_v41 = vor.u32 %v2576_v31, %v2255_v34  ;;  %1085 = vmatpush.bf16.msra.mxu3 %v411_v37  ;;  %v2580_v46 = vld [vmem:[%s3978_s1 + $0x24] sm:$0xf]  ;;  %v2271_v47 = vld [vmem:[%s3978_s1 + $0x30] sm:$0xf0]  ;;  %v2892_v52 = vor.u32 %v2582_v45, %v2269_v44  ;;  %v2285_v56 = vld [vmem:[%s3978_s1 + $0x40] sm:$0xf] }
  0x34   : > { %819 = vmatmul.bf16.vlgmr.msra.gmra.mxu0 %v2856_v40  ;;  %v2894_v53 = vor.u32 %v2580_v46, %v2271_v47  ;;  %v2586_v57 = vld [vmem:[%s3978_s1 + $0x4c] sm:$0xf0]  ;;  %v2584_v58 = vld [vmem:[%s3978_s1 + $0x44] sm:$0xf]  ;;  %v2287_v59 = vld [vmem:[%s3978_s1 + $0x50] sm:$0xf0] }
  0x35   : > { %908 = vmatmul.bf16.vlgmr.msra.gmra.mxu1 %v2858_v41  ;;  %997 = vmatmul.bf16.vlgmr.msra.gmra.mxu2 %v2860_v42  ;;  %v2928_v0 = vor.u32 %v2586_v57, %v2285_v56  ;;  %v2930_v1 = vor.u32 %v2584_v58, %v2287_v59  ;;  %v2301_v4 = vld [vmem:[%s3978_s1 + $0x60] sm:$0xf]  ;;  %v2590_v5 = vld [vmem:[%s3978_s1 + $0x6c] sm:$0xf0]  ;;  %v2588_v6 = vld [vmem:[%s3978_s1 + $0x64] sm:$0xf] }
  0x36   : > { %1086 = vmatmul.bf16.vlgmr.msra.gmra.mxu3 %v2862_v43  ;;  %v2303_v7 = vld [vmem:[%s3978_s1 + $0x70] sm:$0xf0]  ;;  %v2964_v12 = vor.u32 %v2590_v5, %v2301_v4  ;;  %v2317_v16 = vld [vmem:[%s3978_s1 + $0x80] sm:$0xf]  ;;  %v2594_v17 = vld [vmem:[%s3978_s1 + $0x8c] sm:$0xf0] }
  0x37   : > { %v2966_v13 = vor.u32 %v2588_v6, %v2303_v7  ;;  %v2592_v18 = vld [vmem:[%s3978_s1 + $0x84] sm:$0xf]  ;;  %v2319_v19 = vld [vmem:[%s3978_s1 + $0x90] sm:$0xf0]  ;;  %v2327_v23 = vld [vmem:[%s3978_s1 + $0x98] sm:$0xf0]  ;;  %v3000_v24 = vor.u32 %v2594_v17, %v2317_v16 }
  0x38   : > { %v3002_v25 = vor.u32 %v2592_v18, %v2319_v19  ;;  %v3006_v27 = vor.u32 %v2593_v22, %v2327_v23  ;;  %v2333_v28 = vld [vmem:[%s3978_s1 + $0xa0] sm:$0xf]  ;;  %v2598_v29 = vld [vmem:[%s3978_s1 + $0xac] sm:$0xf0]  ;;  %v2596_v30 = vld [vmem:[%s3978_s1 + $0xa4] sm:$0xf] }
  0x39   : > { %v2335_v31 = vld [vmem:[%s3978_s1 + $0xb0] sm:$0xf0]  ;;  %v2341_v32 = vld [vmem:[%s3978_s1 + $0xa8] sm:$0xf]  ;;  %v2599_v33 = vld [vmem:[%s3978_s1 + $0xb4] sm:$0xf0]  ;;  %v3036_v36 = vor.u32 %v2598_v29, %v2333_v28 }
  0x3a   : > { %4027 = vst [vmem:[#allocation2_spill] sm:$0xff] %v3006_v27  ;;  %v2597_v34 = vld [vmem:[%s3978_s1 + $0xac] sm:$0xf]  ;;  %v2343_v35 = vld [vmem:[%s3978_s1 + $0xb8] sm:$0xf0]  ;;  %v3038_v37 = vor.u32 %v2596_v30, %v2335_v31  ;;  %v3040_v38 = vor.u32 %v2599_v33, %v2341_v32 }
  0x3b   : > { %4028 = vst [vmem:[#allocation3_spill] sm:$0xff] %v3036_v36  ;;  %v3042_v39 = vor.u32 %v2597_v34, %v2343_v35  ;;  %v2349_v44 = vld [vmem:[%s3978_s1 + $0xc0] sm:$0xf]  ;;  %v2602_v45 = vld [vmem:[%s3978_s1 + $0xcc] sm:$0xf0] }
  0x3c   : > { %4029 = vst [vmem:[#allocation4_spill] sm:$0xff] %v3038_v37  ;;  %v2600_v46 = vld [vmem:[%s3978_s1 + $0xc4] sm:$0xf]  ;;  %v2351_v47 = vld [vmem:[%s3978_s1 + $0xd0] sm:$0xf0]  ;;  %v3072_v56 = vor.u32 %v2602_v45, %v2349_v44 }
  0x3d   : > { %4030 = vst [vmem:[#allocation5_spill] sm:$0xff] %v3040_v38  ;;  %v2357_v48 = vld [vmem:[%s3978_s1 + $0xc8] sm:$0xf]  ;;  %v2603_v49 = vld [vmem:[%s3978_s1 + $0xd4] sm:$0xf0]  ;;  %v3074_v57 = vor.u32 %v2600_v46, %v2351_v47 }
  0x3e   : > { %4031 = vst [vmem:[#allocation6_spill] sm:$0xff] %v3042_v39  ;;  %v2601_v50 = vld [vmem:[%s3978_s1 + $0xcc] sm:$0xf]  ;;  %v2359_v51 = vld [vmem:[%s3978_s1 + $0xd8] sm:$0xf0]  ;;  %v3076_v58 = vor.u32 %v2603_v49, %v2357_v48 }
  0x3f   : > { %4032 = vst [vmem:[#allocation7_spill] sm:$0xff] %v3072_v56  ;;  %v3078_v59 = vor.u32 %v2601_v50, %v2359_v51  ;;  %v2365_v60 = vld [vmem:[%s3978_s1 + $0xe0] sm:$0xf]  ;;  %v2606_v61 = vld [vmem:[%s3978_s1 + $0xec] sm:$0xf0] }
  0x40   : > { %4033 = vst [vmem:[#allocation8_spill] sm:$0xff] %v3074_v57  ;;  %v2604_v62 = vld [vmem:[%s3978_s1 + $0xe4] sm:$0xf]  ;;  %v2367_v63 = vld [vmem:[%s3978_s1 + $0xf0] sm:$0xf0]  ;;  %v3108_v8 = vor.u32 %v2606_v61, %v2365_v60 }
  0x41   : > { %4034 = vst [vmem:[#allocation9_spill] sm:$0xff] %v3076_v58  ;;  %v2373_v4 = vld [vmem:[%s3978_s1 + $0xe8] sm:$0xf]  ;;  %v2607_v5 = vld [vmem:[%s3978_s1 + $0xf4] sm:$0xf0]  ;;  %v3110_v9 = vor.u32 %v2604_v62, %v2367_v63 }
  0x42   : > { %4035 = vst [vmem:[#allocation10_spill] sm:$0xff] %v3078_v59  ;;  %v2605_v6 = vld [vmem:[%s3978_s1 + $0xec] sm:$0xf]  ;;  %v2375_v7 = vld [vmem:[%s3978_s1 + $0xf8] sm:$0xf0]  ;;  %v3112_v10 = vor.u32 %v2607_v5, %v2373_v4 }
  0x43   : > { %4036 = vst [vmem:[#allocation11_spill] sm:$0xff] %v3108_v8  ;;  %v3114_v11 = vor.u32 %v2605_v6, %v2375_v7  ;;  %v2381_v16 = vld [vmem:[%s3978_s1 + $0x100] sm:$0xf]  ;;  %v2610_v17 = vld [vmem:[%s3978_s1 + $0x10c] sm:$0xf0] }
  0x44   : > { %824 = vmatmul.bf16.gmra.mxu0 %v2892_v52  ;;  %4037 = vst [vmem:[#allocation12_spill] sm:$0xff] %v3110_v9  ;;  %v2608_v18 = vld [vmem:[%s3978_s1 + $0x104] sm:$0xf]  ;;  %v2383_v19 = vld [vmem:[%s3978_s1 + $0x110] sm:$0xf0]  ;;  %v3144_v28 = vor.u32 %v2610_v17, %v2381_v16 }
  0x45   : > { %913 = vmatmul.bf16.gmra.mxu1 %v2894_v53  ;;  %1002 = vmatmul.bf16.gmra.mxu2 %v2896_v54  ;;  %4038 = vst [vmem:[#allocation13_spill] sm:$0xff] %v3112_v10  ;;  %v2389_v20 = vld [vmem:[%s3978_s1 + $0x108] sm:$0xf]  ;;  %v2611_v21 = vld [vmem:[%s3978_s1 + $0x114] sm:$0xf0]  ;;  %v3146_v30 = vor.u32 %v2608_v18, %v2383_v19 }
  0x46   : > { %1091 = vmatmul.bf16.gmra.mxu3 %v2898_v55  ;;  %4039 = vst [vmem:[#allocation14_spill] sm:$0xff] %v3114_v11  ;;  %v2609_v22 = vld [vmem:[%s3978_s1 + $0x10c] sm:$0xf]  ;;  %v2391_v23 = vld [vmem:[%s3978_s1 + $0x118] sm:$0xf0]  ;;  %v3148_v31 = vor.u32 %v2611_v21, %v2389_v20 }
  0x47   : > { %4040 = vst [vmem:[#allocation15_spill] sm:$0xff] %v3144_v28  ;;  %v3150_v33 = vor.u32 %v2609_v22, %v2391_v23  ;;  %v2397_v50 = vld [vmem:[%s3978_s1 + $0x120] sm:$0xf]  ;;  %v2614_v51 = vld [vmem:[%s3978_s1 + $0x12c] sm:$0xf0] }
  0x48   : > { %4041 = vst [vmem:[#allocation16_spill] sm:$0xff] %v3146_v30  ;;  %v2612_v60 = vld [vmem:[%s3978_s1 + $0x124] sm:$0xf]  ;;  %v2399_v61 = vld [vmem:[%s3978_s1 + $0x130] sm:$0xf0]  ;;  %v3180_v7 = vor.u32 %v2614_v51, %v2397_v50 }
  0x49   : > { %4042 = vst [vmem:[#allocation17_spill] sm:$0xff] %v3148_v31  ;;  %v2405_v62 = vld [vmem:[%s3978_s1 + $0x128] sm:$0xf]  ;;  %v2615_v63 = vld [vmem:[%s3978_s1 + $0x134] sm:$0xf0]  ;;  %v3182_v19 = vor.u32 %v2612_v60, %v2399_v61 }
  0x4a   : > { %4043 = vst [vmem:[#allocation18_spill] sm:$0xff] %v3150_v33  ;;  %v2613_v4 = vld [vmem:[%s3978_s1 + $0x12c] sm:$0xf]  ;;  %v2407_v5 = vld [vmem:[%s3978_s1 + $0x138] sm:$0xf0]  ;;  %v3184_v20 = vor.u32 %v2615_v63, %v2405_v62 }
  0x4b   : > { %4044 = vst [vmem:[#allocation19_spill] sm:$0xff] %v3180_v7  ;;  %v3186_v22 = vor.u32 %v2613_v4, %v2407_v5  ;;  %v2618_v60 = vld [vmem:[%s3978_s1 + $0x14c] sm:$0xf0]  ;;  %v2616_v61 = vld [vmem:[%s3978_s1 + $0x144] sm:$0xf] }
  0x4c   : > { %4045 = vst [vmem:[#allocation20_spill] sm:$0xff] %v3182_v19  ;;  %v2415_v62 = vld [vmem:[%s3978_s1 + $0x150] sm:$0xf0]  ;;  %v2421_v63 = vld [vmem:[%s3978_s1 + $0x148] sm:$0xf] }
  0x4d   : > { %4046 = vst [vmem:[#allocation21_spill] sm:$0xff] %v3184_v20  ;;  %v2619_v4 = vld [vmem:[%s3978_s1 + $0x154] sm:$0xf0]  ;;  %v2617_v5 = vld [vmem:[%s3978_s1 + $0x14c] sm:$0xf] }
  0x4e   : > { %4047 = vst [vmem:[#allocation22_spill] sm:$0xff] %v3186_v22 }
  0x54   : > { %829 = vmatmul.bf16.gmra.mxu0 %v2928_v0 }
  0x55   : > { %918 = vmatmul.bf16.gmra.mxu1 %v2930_v1  ;;  %1007 = vmatmul.bf16.gmra.mxu2 %v2932_v2 }
  0x56   : > { %1096 = vmatmul.bf16.gmra.mxu3 %v2934_v3 }
  0x64   : > { %834 = vmatmul.bf16.gmra.mxu0 %v2964_v12 }
  0x65   : > { %923 = vmatmul.bf16.gmra.mxu1 %v2966_v13  ;;  %1012 = vmatmul.bf16.gmra.mxu2 %v2968_v14 }
  0x66   : > { %1101 = vmatmul.bf16.gmra.mxu3 %v2970_v15 }
  0x74   : > { %839 = vmatmul.bf16.gmra.mxu0 %v3000_v24 }
  0x75   : > { %928 = vmatmul.bf16.gmra.mxu1 %v3002_v25  ;;  %1017 = vmatmul.bf16.gmra.mxu2 %v3004_v26 }
  0x76   : > { %1106 = vmatmul.bf16.gmra.mxu3 %v3006_v27 }
  0x84   : > { %844 = vmatmul.bf16.gmra.mxu0 %v3036_v36 }
  0x85   : > { %933 = vmatmul.bf16.gmra.mxu1 %v3038_v37  ;;  %1022 = vmatmul.bf16.gmra.mxu2 %v3040_v38 }
  0x86   : > { %1111 = vmatmul.bf16.gmra.mxu3 %v3042_v39  ;;  %v268_v39 = vld [vmem:[%s2766_s22 + $0x108] sm:$0xff] }
  0x94   : > { %849 = vmatmul.bf16.gmra.mxu0 %v3072_v56  ;;  %v238_v56 = vld [vmem:[%s2766_s22 + $0x18] sm:$0xff] }
  0x95   : > { %938 = vmatmul.bf16.gmra.mxu1 %v3074_v57  ;;  %1027 = vmatmul.bf16.gmra.mxu2 %v3076_v58  ;;  %v236_v57 = vld [vmem:[%s2766_s22 + $0x8] sm:$0xff] }
  0x96   : > { %1116 = vmatmul.bf16.gmra.mxu3 %v3078_v59  ;;  %v338_v59 = vld [vmem:[%s2766_s22 + $0x338] sm:$0xff] }
  0xa4   : > { %854 = vmatmul.bf16.gmra.mxu0 %v3108_v8  ;;  %v336_v8 = vld [vmem:[%s2766_s22 + $0x328] sm:$0xff] }
  0xa5   : > { %943 = vmatmul.bf16.gmra.mxu1 %v3110_v9  ;;  %1032 = vmatmul.bf16.gmra.mxu2 %v3112_v10  ;;  %v2635_v10 = vld [vmem:[%s3978_s1 + $0x1d4] sm:$0xf0] }
  0xa6   : > { %1121 = vmatmul.bf16.gmra.mxu3 %v3114_v11  ;;  %v348_v11 = vld [vmem:[%s2766_s22 + $0x388] sm:$0xff] }
  0xb1   : > { %v820_v29 = vpop.f32.mrf.mxu0 }
  0xb2   : > { %v909_v32 = vpop.f32.mrf.mxu1 }
  0xb3   : > { %v910_v34 = vadd.f32 %v909_v32, %v820_v29 }
  0xb4   : > { %859 = vmatmul.bf16.gmra.mxu0 %v3144_v28 }
  0xb5   : > { %948 = vmatmul.bf16.gmra.mxu1 %v3146_v30  ;;  %1037 = vmatmul.bf16.gmra.mxu2 %v3148_v31 }
  0xb6   : > { %1126 = vmatmul.bf16.gmra.mxu3 %v3150_v33 }
  0xb8   : > { %v998_v35 = vpop.f32.mrf.mxu2 }
  0xb9   : > { %v999_v44 = vadd.f32 %v998_v35, %v910_v34  ;;  %v1087_v45 = vpop.f32.mrf.mxu3  ;;  %v822_v46 = vpop.f32.mrf.mxu0 }
  0xba   : > { %v911_v47 = vpop.f32.mrf.mxu1 }
  0xbb   : > { %v1088_v48 = vadd.f32 %v1087_v45, %v999_v44  ;;  %v912_v49 = vadd.f32 %v911_v47, %v822_v46 }
  0xbd   : > { %v1523_v32 = vmax.f32 %v1088_v48, 0.0  ;;  %v2413_v48 = vld [vmem:[%s3978_s1 + $0x140] sm:$0xf] }
  0xc0   : > { %v1000_v6 = vpop.f32.mrf.mxu2 }
  0xc1   : > { %v1001_v16 = vadd.f32 %v1000_v6, %v912_v49  ;;  %v1089_v17 = vpop.f32.mrf.mxu3  ;;  %v825_v18 = vpop.f32.mrf.mxu0  ;;  %v2423_v6 = vld [vmem:[%s3978_s1 + $0x158] sm:$0xf0] }
  0xc2   : > { %v914_v21 = vpop.f32.mrf.mxu1 }
  0xc3   : > { %v1090_v23 = vadd.f32 %v1089_v17, %v1001_v16  ;;  %v915_v29 = vadd.f32 %v914_v21, %v825_v18  ;;  %v3218_v17 = vor.u32 %v2618_v60, %v2413_v48 }
  0xc4   : > { %864 = vmatmul.bf16.gmra.mxu0 %v3180_v7  ;;  %v354_v7 = vld [vmem:[%s2766_s22 + $0x3b8] sm:$0xff] }
  0xc5   : > { %v1525_v34 = vmax.f32 %v1090_v23, 0.0  ;;  %953 = vmatmul.bf16.gmra.mxu1 %v3182_v19  ;;  %1042 = vmatmul.bf16.gmra.mxu2 %v3184_v20  ;;  %4048 = vst [vmem:[#allocation23_spill] sm:$0xff] %v3218_v17  ;;  %v352_v19 = vld [vmem:[%s2766_s22 + $0x3a8] sm:$0xff] }
  0xc6   : > { %1131 = vmatmul.bf16.gmra.mxu3 %v3186_v22 }
  0xc7   : > { %v3192_v35 = vpack.c.bf16 %v1525_v34, %v1523_v32  ;;  %v3222_v32 = vor.u32 %v2619_v4, %v2421_v63 }
  0xc8   : > { %v1003_v44 = vpop.f32.mrf.mxu2 }
  0xc9   : > { %v1004_v45 = vadd.f32 %v1003_v44, %v915_v29  ;;  %v1092_v46 = vpop.f32.mrf.mxu3  ;;  %v827_v47 = vpop.f32.mrf.mxu0  ;;  %v3220_v29 = vor.u32 %v2616_v61, %v2415_v62  ;;  %4050 = vst [vmem:[#allocation25_spill] sm:$0xff] %v3222_v32  ;;  %v3224_v44 = vor.u32 %v2617_v5, %v2423_v6  ;;  %v2622_v6 = vld [vmem:[%s3978_s1 + $0x16c] sm:$0xf0] }
  0xca   : > { %v916_v49 = vpop.f32.mrf.mxu1 }
  0xcb   : > { %v1093_v50 = vadd.f32 %v1092_v46, %v1004_v45  ;;  %v917_v51 = vadd.f32 %v916_v49, %v827_v47  ;;  %4049 = vst [vmem:[#allocation24_spill] sm:$0xff] %v3220_v29 }
  0xcc   : > { %4051 = vst [vmem:[#allocation26_spill] sm:$0xff] %v3224_v44 }
  0xcd   : > { %v1527_v47 = vmax.f32 %v1093_v50, 0.0  ;;  %v2429_v50 = vld [vmem:[%s3978_s1 + $0x160] sm:$0xf] }
  0xd0   : > { %v1005_v16 = vpop.f32.mrf.mxu2 }
  0xd1   : > { %v1006_v18 = vadd.f32 %v1005_v16, %v917_v51  ;;  %v1094_v21 = vpop.f32.mrf.mxu3  ;;  %v830_v23 = vpop.f32.mrf.mxu0  ;;  %v2620_v16 = vld [vmem:[%s3978_s1 + $0x164] sm:$0xf] }
  0xd2   : > { %v919_v34 = vpop.f32.mrf.mxu1 }
  0xd3   : > { %v1095_v45 = vadd.f32 %v1094_v21, %v1006_v18  ;;  %v920_v46 = vadd.f32 %v919_v34, %v830_v23  ;;  %v2431_v18 = vld [vmem:[%s3978_s1 + $0x170] sm:$0xf0]  ;;  %v2437_v21 = vld [vmem:[%s3978_s1 + $0x168] sm:$0xf]  ;;  %v2623_v23 = vld [vmem:[%s3978_s1 + $0x174] sm:$0xf0] }
  0xd4   : > { %869 = vmatmul.bf16.gmra.mxu0 %v3218_v17  ;;  %v2621_v34 = vld [vmem:[%s3978_s1 + $0x16c] sm:$0xf] }
  0xd5   : > { %v1529_v49 = vmax.f32 %v1095_v45, 0.0  ;;  %958 = vmatmul.bf16.gmra.mxu1 %v3220_v29  ;;  %1047 = vmatmul.bf16.gmra.mxu2 %v3222_v32  ;;  %v2439_v45 = vld [vmem:[%s3978_s1 + $0x178] sm:$0xf0] }
  0xd6   : > { %1136 = vmatmul.bf16.gmra.mxu3 %v3224_v44  ;;  %v3262_v44 = vor.u32 %v2621_v34, %v2439_v45  ;;  %v2627_v45 = vld [vmem:[%s3978_s1 + $0x194] sm:$0xf0] }
  0xd7   : > { %v3230_v51 = vpack.c.bf16 %v1529_v49, %v1527_v47  ;;  %v3256_v47 = vor.u32 %v2622_v6, %v2429_v50 }
  0xd8   : > { %v1008_v48 = vpop.f32.mrf.mxu2  ;;  %4055 = vst [vmem:[#allocation30_spill] sm:$0xff] %v3262_v44 }
  0xd9   : > { %v1009_v60 = vadd.f32 %v1008_v48, %v920_v46  ;;  %v1097_v61 = vpop.f32.mrf.mxu3  ;;  %v832_v62 = vpop.f32.mrf.mxu0  ;;  %4052 = vst [vmem:[#allocation27_spill] sm:$0xff] %v3256_v47 }
  0xda   : > { %v921_v63 = vpop.f32.mrf.mxu1 }
  0xdb   : > { %v1098_v4 = vadd.f32 %v1097_v61, %v1009_v60  ;;  %v922_v5 = vadd.f32 %v921_v63, %v832_v62  ;;  %v3258_v61 = vor.u32 %v2620_v16, %v2431_v18  ;;  %v3260_v62 = vor.u32 %v2623_v23, %v2437_v21 }
  0xdd   : > { %4053 = vst [vmem:[#allocation28_spill] sm:$0xff] %v3258_v61  ;;  %v1531_v17 = vmax.f32 %v1098_v4, 0.0  ;;  %v2445_v4 = vld [vmem:[%s3978_s1 + $0x180] sm:$0xf] }
  0xde   : > { %4054 = vst [vmem:[#allocation29_spill] sm:$0xff] %v3260_v62 }
  0xe0   : > { %v1010_v46 = vpop.f32.mrf.mxu2 }
  0xe1   : > { %v1011_v49 = vadd.f32 %v1010_v46, %v922_v5  ;;  %v1099_v48 = vpop.f32.mrf.mxu3  ;;  %v835_v60 = vpop.f32.mrf.mxu0  ;;  %v2625_v46 = vld [vmem:[%s3978_s1 + $0x18c] sm:$0xf] }
  0xe2   : > { %v924_v63 = vpop.f32.mrf.mxu1 }
  0xe3   : > { %v1100_v32 = vadd.f32 %v1099_v48, %v1011_v49  ;;  %v925_v29 = vadd.f32 %v924_v63, %v835_v60  ;;  %v2455_v49 = vld [vmem:[%s3978_s1 + $0x198] sm:$0xf0] }
  0xe4   : > { %874 = vmatmul.bf16.gmra.mxu0 %v3256_v47  ;;  %v356_v47 = vld [vmem:[%s2766_s22 + $0x3c8] sm:$0xff] }
  0xe5   : > { %v1533_v22 = vmax.f32 %v1100_v32, 0.0  ;;  %963 = vmatmul.bf16.gmra.mxu1 %v3258_v61  ;;  %1052 = vmatmul.bf16.gmra.mxu2 %v3260_v62  ;;  %v2626_v32 = vld [vmem:[%s3978_s1 + $0x18c] sm:$0xf0] }
  0xe6   : > { %1141 = vmatmul.bf16.gmra.mxu3 %v3262_v44  ;;  %v3294_v60 = vor.u32 %v2626_v32, %v2445_v4  ;;  %v3300_v44 = vor.u32 %v2625_v46, %v2455_v49  ;;  %v264_v32 = vld [vmem:[%s2766_s22 + $0xe8] sm:$0xff] }
  0xe7   : > { %v3268_v5 = vpack.c.bf16 %v1533_v22, %v1531_v17  ;;  %v2624_v22 = vld [vmem:[%s3978_s1 + $0x184] sm:$0xf]  ;;  %v2447_v17 = vld [vmem:[%s3978_s1 + $0x190] sm:$0xf0]  ;;  %v328_v49 = vld [vmem:[%s2766_s22 + $0x2e8] sm:$0xff] }
  0xe8   : > { %v1013_v50 = vpop.f32.mrf.mxu2  ;;  %4056 = vst [vmem:[#allocation31_spill] sm:$0xff] %v3294_v60 }
  0xe9   : > { %v1014_v6 = vadd.f32 %v1013_v50, %v925_v29  ;;  %v1102_v16 = vpop.f32.mrf.mxu3  ;;  %v837_v18 = vpop.f32.mrf.mxu0  ;;  %v2453_v29 = vld [vmem:[%s3978_s1 + $0x188] sm:$0xf]  ;;  %4059 = vst [vmem:[#allocation34_spill] sm:$0xff] %v3300_v44 }
  0xea   : > { %v926_v21 = vpop.f32.mrf.mxu1 }
  0xeb   : > { %v1103_v23 = vadd.f32 %v1102_v16, %v1014_v6  ;;  %v927_v34 = vadd.f32 %v926_v21, %v837_v18  ;;  %v3296_v16 = vor.u32 %v2624_v22, %v2447_v17  ;;  %v3298_v18 = vor.u32 %v2627_v45, %v2453_v29  ;;  %v266_v22 = vld [vmem:[%s2766_s22 + $0xf8] sm:$0xff]  ;;  %v296_v17 = vld [vmem:[%s2766_s22 + $0x1e8] sm:$0xff] }
  0xec   : > { %v298_v29 = vld [vmem:[%s2766_s22 + $0x1f8] sm:$0xff]  ;;  %v378_v45 = vpack.c.bf16 %v266_v22, %v264_v32 }
  0xed   : > { %4057 = vst [vmem:[#allocation32_spill] sm:$0xff] %v3296_v16  ;;  %v394_v46 = vpack.c.bf16 %v298_v29, %v296_v17  ;;  %v292_v29 = vld [vmem:[%s2766_s22 + $0x1c8] sm:$0xff] }
  0xee   : > { %4058 = vst [vmem:[#allocation33_spill] sm:$0xff] %v3298_v18  ;;  %1167 = vmatpush.bf16.msrb.mxu0 %v378_v45  ;;  %v2630_v45 = vld [vmem:[%s3978_s1 + $0x1ac] sm:$0xf0] }
  0xef   : > { %1256 = vmatpush.bf16.msrb.mxu1 %v394_v46 }
  0xf0   : > { %v1015_v48 = vpop.f32.mrf.mxu2 }
  0xf1   : > { %v1016_v63 = vadd.f32 %v1015_v48, %v927_v34  ;;  %v1104_v50 = vpop.f32.mrf.mxu3  ;;  %v840_v6 = vpop.f32.mrf.mxu0  ;;  %v1535_v34 = vmax.f32 %v1103_v23, 0.0  ;;  %v330_v48 = vld [vmem:[%s2766_s22 + $0x2f8] sm:$0xff] }
  0xf2   : > { %v929_v21 = vpop.f32.mrf.mxu1 }
  0xf3   : > { %v1105_v62 = vadd.f32 %v1104_v50, %v1016_v63  ;;  %v930_v61 = vadd.f32 %v929_v21, %v840_v6  ;;  %v410_v50 = vpack.c.bf16 %v330_v48, %v328_v49  ;;  %v362_v6 = vld [vmem:[%s2766_s22 + $0x3f8] sm:$0xff]  ;;  %v260_v21 = vld [vmem:[%s2766_s22 + $0xc8] sm:$0xff] }
  0xf4   : > { %879 = vmatmul.bf16.gmra.mxu0 %v3294_v60  ;;  %v294_v60 = vld [vmem:[%s2766_s22 + $0x1d8] sm:$0xff] }
  0xf5   : > { %v1537_v4 = vmax.f32 %v1105_v62, 0.0  ;;  %968 = vmatmul.bf16.gmra.mxu1 %v3296_v16  ;;  %1057 = vmatmul.bf16.gmra.mxu2 %v3298_v18  ;;  %v360_v62 = vld [vmem:[%s2766_s22 + $0x3e8] sm:$0xff]  ;;  %v392_v49 = vpack.c.bf16 %v294_v60, %v292_v29  ;;  %v326_v48 = vld [vmem:[%s2766_s22 + $0x2d8] sm:$0xff]  ;;  %v2628_v60 = vld [vmem:[%s3978_s1 + $0x1a4] sm:$0xf] }
  0xf6   : > { %1146 = vmatmul.bf16.gmra.mxu3 %v3300_v44  ;;  %v262_v44 = vld [vmem:[%s2766_s22 + $0xd8] sm:$0xff]  ;;  %v426_v22 = vpack.c.bf16 %v362_v6, %v360_v62  ;;  %1345 = vmatpush.bf16.msrb.mxu2 %v410_v50  ;;  %v256_v50 = vld [vmem:[%s2766_s22 + $0xa8] sm:$0xff] }
  0xf7   : > { %v3313_v23 = vpack.c.bf16 %v1537_v4, %v1535_v34  ;;  %v376_v17 = vpack.c.bf16 %v262_v44, %v260_v21  ;;  %v324_v34 = vld [vmem:[%s2766_s22 + $0x2c8] sm:$0xff]  ;;  %v2461_v44 = vld [vmem:[%s3978_s1 + $0x1a0] sm:$0xf]  ;;  %v258_v6 = vld [vmem:[%s2766_s22 + $0xb8] sm:$0xff]  ;;  %1257 = vmatpush.bf16.msrb.mxu1 %v392_v49 }
  0xf8   : > { %v1018_v63 = vpop.f32.mrf.mxu2  ;;  %1434 = vmatpush.bf16.msrb.mxu3 %v426_v22  ;;  %v408_v46 = vpack.c.bf16 %v326_v48, %v324_v34  ;;  %v288_v21 = vld [vmem:[%s2766_s22 + $0x1a8] sm:$0xff]  ;;  %v290_v22 = vld [vmem:[%s2766_s22 + $0x1b8] sm:$0xff] }
  0xf9   : > { %v1019_v18 = vadd.f32 %v1018_v63, %v930_v61  ;;  %v1107_v16 = vpop.f32.mrf.mxu3  ;;  %v3318_v32 = vpop.f32.mrf.mxu0  ;;  %v358_v61 = vld [vmem:[%s2766_s22 + $0x3d8] sm:$0xff]  ;;  %1168 = vmatpush.bf16.msrb.mxu0 %v376_v17  ;;  %v320_v29 = vld [vmem:[%s2766_s22 + $0x2a8] sm:$0xff] }
  0xfa   : > { %v3323_v4 = vpop.f32.mrf.mxu1  ;;  %v424_v62 = vpack.c.bf16 %v358_v61, %v356_v47  ;;  %v374_v47 = vpack.c.bf16 %v258_v6, %v256_v50  ;;  %v322_v34 = vld [vmem:[%s2766_s22 + $0x2b8] sm:$0xff]  ;;  %1346 = vmatpush.bf16.msrb.mxu2 %v408_v46  ;;  %v390_v61 = vpack.c.bf16 %v290_v22, %v288_v21  ;;  %v2629_v17 = vld [vmem:[%s3978_s1 + $0x1ac] sm:$0xf]  ;;  %v422_v50 = vpack.c.bf16 %v354_v7, %v352_v19 }
  0xfb   : > { %v3328_v63 = vadd.f32 %v1107_v16, %v1019_v18  ;;  %v2463_v16 = vld [vmem:[%s3978_s1 + $0x1b0] sm:$0xf0]  ;;  %v2469_v18 = vld [vmem:[%s3978_s1 + $0x1a8] sm:$0xf]  ;;  %v2631_v48 = vld [vmem:[%s3978_s1 + $0x1b4] sm:$0xf0]  ;;  %v406_v20 = vpack.c.bf16 %v322_v34, %v320_v29  ;;  %v3364_v46 = vor.u32 %v2630_v45, %v2461_v44 }
  0xfc   : > { %v2471_v49 = vld [vmem:[%s3978_s1 + $0x1b8] sm:$0xf0]  ;;  %1435 = vmatpush.bf16.msrb.mxu3 %v424_v62  ;;  %v252_v21 = vld [vmem:[%s2766_s22 + $0x88] sm:$0xff]  ;;  %v3373_v31 = vor.u32 %v2628_v60, %v2463_v16  ;;  %v3375_v30 = vor.u32 %v2631_v48, %v2469_v18  ;;  %1258 = vmatpush.bf16.msrb.mxu1 %v390_v61 }
  0xfd   : > { %4060 = vst [vmem:[#allocation35_spill] sm:$0xff] %v3364_v46  ;;  %v254_v22 = vld [vmem:[%s2766_s22 + $0x98] sm:$0xff]  ;;  %v284_v29 = vld [vmem:[%s2766_s22 + $0x188] sm:$0xff]  ;;  %1169 = vmatpush.bf16.msrb.mxu0 %v374_v47  ;;  %v3382_v62 = vor.u32 %v2629_v17, %v2471_v49 }
  0xfe   : > { %4061 = vst [vmem:[#allocation36_spill] sm:$0xff] %v3373_v31  ;;  %v286_v7 = vld [vmem:[%s2766_s22 + $0x198] sm:$0xff]  ;;  %v316_v19 = vld [vmem:[%s2766_s22 + $0x288] sm:$0xff]  ;;  %1347 = vmatpush.bf16.msrb.mxu2 %v406_v20  ;;  %v372_v28 = vpack.c.bf16 %v254_v22, %v252_v21 }
  0xff   : > { %4062 = vst [vmem:[#allocation37_spill] sm:$0xff] %v3375_v30  ;;  %v318_v44 = vld [vmem:[%s2766_s22 + $0x298] sm:$0xff]  ;;  %v388_v16 = vpack.c.bf16 %v286_v7, %v284_v29  ;;  %v248_v48 = vld [vmem:[%s2766_s22 + $0x68] sm:$0xff] }
 0x100   : > { %v3362_v6 = vpop.f32.mrf.mxu2  ;;  %4063 = vst [vmem:[#allocation38_spill] sm:$0xff] %v3382_v62  ;;  %v350_v60 = vld [vmem:[%s2766_s22 + $0x398] sm:$0xff]  ;;  %1436 = vmatpush.bf16.msrb.mxu3 %v422_v50  ;;  %v404_v18 = vpack.c.bf16 %v318_v44, %v316_v19  ;;  %v280_v61 = vld [vmem:[%s2766_s22 + $0x168] sm:$0xff] }
 0x101   : > { %v3369_v34 = vpop.f32.mrf.mxu3  ;;  %v3371_v33 = vpop.f32.mrf.mxu0  ;;  %v420_v47 = vpack.c.bf16 %v350_v60, %v348_v11  ;;  %1170 = vmatpush.bf16.msrb.mxu0 %v372_v28  ;;  %v250_v20 = vld [vmem:[%s2766_s22 + $0x78] sm:$0xff]  ;;  %1259 = vmatpush.bf16.msrb.mxu1 %v388_v16  ;;  %v312_v50 = vld [vmem:[%s2766_s22 + $0x268] sm:$0xff] }
 0x102   : > { %v3380_v45 = vpop.f32.mrf.mxu1  ;;  %v282_v17 = vld [vmem:[%s2766_s22 + $0x178] sm:$0xff]  ;;  %1348 = vmatpush.bf16.msrb.mxu2 %v404_v18  ;;  %v370_v49 = vpack.c.bf16 %v250_v20, %v248_v48  ;;  %v344_v22 = vld [vmem:[%s2766_s22 + $0x368] sm:$0xff] }
 0x103   : > { %v386_v11 = vpack.c.bf16 %v282_v17, %v280_v61  ;;  %v314_v21 = vld [vmem:[%s2766_s22 + $0x278] sm:$0xff]  ;;  %v244_v19 = vld [vmem:[%s2766_s22 + $0x48] sm:$0xff] }
 0x104   : > { %884 = vmatmul.bf16.gmra.mxu0 %v3364_v46  ;;  %1437 = vmatpush.bf16.msrb.mxu3 %v420_v47  ;;  %v402_v28 = vpack.c.bf16 %v314_v21, %v312_v50  ;;  %v346_v7 = vld [vmem:[%s2766_s22 + $0x378] sm:$0xff]  ;;  %v276_v48 = vld [vmem:[%s2766_s22 + $0x148] sm:$0xff] }
 0x105   : > { %973 = vmatmul.bf16.gmra.mxu1 %v3373_v31  ;;  %1062 = vmatmul.bf16.gmra.mxu2 %v3375_v30  ;;  %v246_v44 = vld [vmem:[%s2766_s22 + $0x58] sm:$0xff]  ;;  %v418_v18 = vpack.c.bf16 %v346_v7, %v344_v22  ;;  %v308_v61 = vld [vmem:[%s2766_s22 + $0x248] sm:$0xff]  ;;  %v2477_v30 = vld [vmem:[%s3978_s1 + $0x1c0] sm:$0xf] }
 0x106   : > { %1151 = vmatmul.bf16.gmra.mxu3 %v3382_v62  ;;  %v278_v20 = vld [vmem:[%s2766_s22 + $0x158] sm:$0xff]  ;;  %1171 = vmatpush.bf16.msrb.mxu0 %v370_v49  ;;  %v368_v62 = vpack.c.bf16 %v246_v44, %v244_v19  ;;  %v340_v50 = vld [vmem:[%s2766_s22 + $0x348] sm:$0xff]  ;;  %v2634_v22 = vld [vmem:[%s3978_s1 + $0x1cc] sm:$0xf0] }
 0x107   : > { %v310_v47 = vld [vmem:[%s2766_s22 + $0x258] sm:$0xff]  ;;  %1260 = vmatpush.bf16.msrb.mxu1 %v386_v11  ;;  %1349 = vmatpush.bf16.msrb.mxu2 %v402_v28  ;;  %v384_v49 = vpack.c.bf16 %v278_v20, %v276_v48  ;;  %v2632_v19 = vld [vmem:[%s3978_s1 + $0x1c4] sm:$0xf]  ;;  %v2479_v44 = vld [vmem:[%s3978_s1 + $0x1d0] sm:$0xf0] }
 0x108   : > { %v3397_v29 = vpop.f32.mrf.mxu2  ;;  %v342_v21 = vld [vmem:[%s2766_s22 + $0x358] sm:$0xff]  ;;  %v400_v7 = vpack.c.bf16 %v310_v47, %v308_v61  ;;  %v2485_v31 = vld [vmem:[%s3978_s1 + $0x1c8] sm:$0xf]  ;;  %1438 = vmatpush.bf16.msrb.mxu3 %v418_v18  ;;  %v2633_v18 = vld [vmem:[%s3978_s1 + $0x1cc] sm:$0xf] }
 0x109   : > { %v3402_v60 = vpop.f32.mrf.mxu3  ;;  %v3404_v16 = vpop.f32.mrf.mxu0  ;;  %v416_v46 = vpack.c.bf16 %v342_v21, %v340_v50  ;;  %v240_v11 = vld [vmem:[%s2766_s22 + $0x28] sm:$0xff]  ;;  %v242_v28 = vld [vmem:[%s2766_s22 + $0x38] sm:$0xff] }
 0x10a   : > { %v3409_v17 = vpop.f32.mrf.mxu1  ;;  %v272_v48 = vld [vmem:[%s2766_s22 + $0x128] sm:$0xff]  ;;  %v274_v20 = vld [vmem:[%s2766_s22 + $0x138] sm:$0xff]  ;;  %1172 = vmatpush.bf16.msrb.mxu0 %v368_v62  ;;  %v366_v9 = vpack.c.bf16 %v242_v28, %v240_v11  ;;  %v3448_v11 = vor.u32 %v2634_v22, %v2477_v30  ;;  %v414_v28 = vpack.c.bf16 %v338_v59, %v336_v8 }
 0x10b   : > { %v304_v61 = vld [vmem:[%s2766_s22 + $0x228] sm:$0xff]  ;;  %v306_v47 = vld [vmem:[%s2766_s22 + $0x238] sm:$0xff]  ;;  %1261 = vmatpush.bf16.msrb.mxu1 %v384_v49  ;;  %1350 = vmatpush.bf16.msrb.mxu2 %v400_v7  ;;  %v382_v21 = vpack.c.bf16 %v274_v20, %v272_v48  ;;  %v3455_v49 = vor.u32 %v2632_v19, %v2479_v44  ;;  %v3457_v7 = vor.u32 %v2635_v10, %v2485_v31  ;;  %v2638_v10 = vld [vmem:[%s3978_s1 + $0x1ec] sm:$0xf0] }
 0x10c   : > { %v2487_v50 = vld [vmem:[%s3978_s1 + $0x1d8] sm:$0xf0]  ;;  %v398_v58 = vpack.c.bf16 %v306_v47, %v304_v61  ;;  %4064 = vst [vmem:[#allocation39_spill] sm:$0xff] %v3448_v11  ;;  %1439 = vmatpush.bf16.msrb.mxu3 %v416_v46  ;;  %v300_v20 = vld [vmem:[%s2766_s22 + $0x208] sm:$0xff]  ;;  %v364_v46 = vpack.c.bf16 %v238_v56, %v236_v57  ;;  %v2636_v31 = vld [vmem:[%s3978_s1 + $0x1e4] sm:$0xf] }
 0x10d   : > { %4065 = vst [vmem:[#allocation40_spill] sm:$0xff] %v3455_v49  ;;  %v270_v48 = vld [vmem:[%s2766_s22 + $0x118] sm:$0xff]  ;;  %v3462_v30 = vor.u32 %v2633_v18, %v2487_v50  ;;  %v332_v59 = vld [vmem:[%s2766_s22 + $0x308] sm:$0xff] }
 0x10e   : > { %4066 = vst [vmem:[#allocation41_spill] sm:$0xff] %v3457_v7  ;;  %v302_v61 = vld [vmem:[%s2766_s22 + $0x218] sm:$0xff]  ;;  %1173 = vmatpush.bf16.msrb.mxu0 %v366_v9  ;;  %v380_v22 = vpack.c.bf16 %v270_v48, %v268_v39  ;;  %v2493_v39 = vld [vmem:[%s3978_s1 + $0x1e0] sm:$0xf]  ;;  %v2501_v44 = vld [vmem:[%s3978_s1 + $0x1e8] sm:$0xf] }
 0x10f   : > { %4067 = vst [vmem:[#allocation42_spill] sm:$0xff] %v3462_v30  ;;  %v334_v8 = vld [vmem:[%s2766_s22 + $0x318] sm:$0xff]  ;;  %1262 = vmatpush.bf16.msrb.mxu1 %v382_v21  ;;  %1351 = vmatpush.bf16.msrb.mxu2 %v398_v58  ;;  %v396_v36 = vpack.c.bf16 %v302_v61, %v300_v20  ;;  %v2637_v50 = vld [vmem:[%s3978_s1 + $0x1ec] sm:$0xf]  ;;  %v3494_v48 = vor.u32 %v2638_v10, %v2493_v39 }
 0x110   : > { %v3446_v62 = vpop.f32.mrf.mxu2  ;;  %1440 = vmatpush.bf16.msrb.mxu3 %v414_v28  ;;  %v412_v19 = vpack.c.bf16 %v334_v8, %v332_v59  ;;  %v2639_v18 = vld [vmem:[%s3978_s1 + $0x1f4] sm:$0xf0]  ;;  %v2503_v21 = vld [vmem:[%s3978_s1 + $0x1f8] sm:$0xf0] }
 0x111   : > { %v3453_v38 = vpop.f32.mrf.mxu3  ;;  %v850_v37 = vpop.f32.mrf.mxu0  ;;  %4068 = vst [vmem:[#allocation43_spill] sm:$0xff] %v3494_v48  ;;  %v3498_v59 = vor.u32 %v2639_v18, %v2501_v44 }
 0x112   : > { %v939_v47 = vpop.f32.mrf.mxu1  ;;  %1174 = vmatpush.bf16.msrb.mxu0 %v364_v46 }
 0x113   : > { %1263 = vmatpush.bf16.msrb.mxu1 %v380_v22  ;;  %1352 = vmatpush.bf16.msrb.mxu2 %v396_v36  ;;  %v2495_v36 = vld [vmem:[%s3978_s1 + $0x1f0] sm:$0xf0]  ;;  %4070 = vst [vmem:[#allocation45_spill] sm:$0xff] %v3498_v59  ;;  %v3500_v22 = vor.u32 %v2637_v50, %v2503_v21  ;;  %v935_v50 = vadd.f32 %v3380_v45, %v3371_v33 }
 0x114   : > { %889 = vmatmul.bf16.gmra.mxu0 %v3448_v11  ;;  %1441 = vmatpush.bf16.msrb.mxu3 %v412_v19  ;;  %v3496_v46 = vor.u32 %v2636_v31, %v2495_v36  ;;  %v940_v31 = vadd.f32 %v939_v47, %v850_v37 }
 0x115   : > { %978 = vmatmul.bf16.gmra.mxu1 %v3455_v49  ;;  %1067 = vmatmul.bf16.gmra.mxu2 %v3457_v7  ;;  %4071 = vst [vmem:[#allocation46_spill] sm:$0xff] %v3500_v22 }
 0x116   : > { %1156 = vmatmul.bf16.gmra.mxu3 %v3462_v30  ;;  %4069 = vst [vmem:[#allocation44_spill] sm:$0xff] %v3496_v46 }
 0x118   : > { %v1028_v56 = vpop.f32.mrf.mxu2 }
 0x119   : > { %v1117_v57 = vpop.f32.mrf.mxu3  ;;  %v852_v9 = vpop.f32.mrf.mxu0 }
 0x11a   : > { %v941_v58 = vpop.f32.mrf.mxu1 }
 0x11b   : > { %v942_v36 = vadd.f32 %v941_v58, %v852_v9 }
 0x120   : > { %v1030_v28 = vpop.f32.mrf.mxu2 }
 0x121   : > { %v1119_v20 = vpop.f32.mrf.mxu3  ;;  %v855_v61 = vpop.f32.mrf.mxu0  ;;  %v1031_v18 = vadd.f32 %v1030_v28, %v942_v36 }
 0x122   : > { %v944_v8 = vpop.f32.mrf.mxu1 }
 0x123   : > { %v945_v39 = vadd.f32 %v944_v8, %v855_v61  ;;  %v1120_v37 = vadd.f32 %v1119_v20, %v1031_v18 }
 0x124   : > { %894 = vmatmul.bf16.gmra.mxu0 %v3494_v48 }
 0x125   : > { %983 = vmatmul.bf16.gmra.mxu1 %v3496_v46  ;;  %1072 = vmatmul.bf16.gmra.mxu2 %v3498_v59  ;;  %v937_v46 = vadd.f32 %v3409_v17, %v3404_v16  ;;  %v1029_v59 = vadd.f32 %v1028_v56, %v940_v31  ;;  %v932_v16 = vadd.f32 %v3323_v4, %v3318_v32 }
 0x126   : > { %1161 = vmatmul.bf16.gmra.mxu3 %v3500_v22 }
 0x127   : > { %v1026_v27 = vadd.f32 %v3446_v62, %v937_v46  ;;  %v1118_v33 = vadd.f32 %v1117_v57, %v1029_v59  ;;  %v1549_v62 = vmax.f32 %v1120_v37, 0.0 }
 0x128   : > { %v1033_v19 = vpop.f32.mrf.mxu2 }
 0x129   : > { %v1122_v10 = vpop.f32.mrf.mxu3  ;;  %v857_v30 = vpop.f32.mrf.mxu0  ;;  %v1034_v44 = vadd.f32 %v1033_v19, %v945_v39  ;;  %v1115_v17 = vadd.f32 %v3453_v38, %v1026_v27  ;;  %v1547_v56 = vmax.f32 %v1118_v33, 0.0 }
 0x12a   : > { %v946_v7 = vpop.f32.mrf.mxu1 }
 0x12b   : > { %v947_v49 = vadd.f32 %v946_v7, %v857_v30  ;;  %v1123_v48 = vadd.f32 %v1122_v10, %v1034_v44  ;;  %v1024_v7 = vadd.f32 %v3397_v29, %v935_v50  ;;  %v1545_v28 = vmax.f32 %v1115_v17, 0.0 }
 0x12c   : > { %v1599_v4 = vpack.c.bf16 %v1549_v62, %v1547_v56 }
 0x12d   : > { %v1551_v45 = vmax.f32 %v1123_v48, 0.0  ;;  %v1113_v29 = vadd.f32 %v3402_v60, %v1024_v7 }
 0x12f   : > { %v1543_v27 = vmax.f32 %v1113_v29, 0.0 }
 0x130   : > { %v1035_v21 = vpop.f32.mrf.mxu2 }
 0x131   : > { %v1036_v22 = vadd.f32 %v1035_v21, %v947_v49  ;;  %v1124_v11 = vpop.f32.mrf.mxu3  ;;  %v860_v61 = vpop.f32.mrf.mxu0  ;;  %v1597_v38 = vpack.c.bf16 %v1545_v28, %v1543_v27 }
 0x132   : > { %v949_v8 = vpop.f32.mrf.mxu1 }
 0x133   : > { %v1125_v47 = vadd.f32 %v1124_v11, %v1036_v22  ;;  %v950_v9 = vadd.f32 %v949_v8, %v860_v61  ;;  %v1539_v22 = vmax.f32 %v3328_v63, 0.0 }
 0x134   : > { %1175 = vmatmul.bf16.vlgmr.msrb.gmra.mxu0 %v2856_v40  ;;  %v1021_v40 = vadd.f32 %v3362_v6, %v932_v16 }
 0x135   : > { %v1553_v30 = vmax.f32 %v1125_v47, 0.0  ;;  %1264 = vmatmul.bf16.vlgmr.msrb.gmra.mxu1 %v2858_v41  ;;  %1353 = vmatmul.bf16.vlgmr.msrb.gmra.mxu2 %v2860_v42 }
 0x136   : > { %1442 = vmatmul.bf16.vlgmr.msrb.gmra.mxu3 %v2862_v43  ;;  %v1110_v43 = vadd.f32 %v3369_v34, %v1021_v40 }
 0x137   : > { %v1601_v11 = vpack.c.bf16 %v1553_v30, %v1551_v45 }
 0x138   : > { %v1038_v49 = vpop.f32.mrf.mxu2  ;;  %v1541_v20 = vmax.f32 %v1110_v43, 0.0 }
 0x139   : > { %v1039_v57 = vadd.f32 %v1038_v49, %v950_v9  ;;  %v1127_v58 = vpop.f32.mrf.mxu3  ;;  %1715 = vmatpush.bf16.msra.mxu0 %v1601_v11  ;;  %v862_v41 = vpop.f32.mrf.mxu0 }
 0x13a   : > { %v951_v42 = vpop.f32.mrf.mxu1  ;;  %v1595_v31 = vpack.c.bf16 %v1541_v20, %v1539_v22 }
 0x13b   : > { %v1128_v48 = vadd.f32 %v1127_v58, %v1039_v57  ;;  %v952_v32 = vadd.f32 %v951_v42, %v862_v41 }
 0x13d   : > { %1716 = vmatpush.bf16.msra.mxu0 %v1599_v4  ;;  %v1555_v36 = vmax.f32 %v1128_v48, 0.0 }
 0x140   : > { %v1040_v6 = vpop.f32.mrf.mxu2 }
 0x141   : > { %v1041_v46 = vadd.f32 %v1040_v6, %v952_v32  ;;  %v1129_v59 = vpop.f32.mrf.mxu3  ;;  %1717 = vmatpush.bf16.msra.mxu0 %v1597_v38  ;;  %v865_v60 = vpop.f32.mrf.mxu0 }
 0x142   : > { %v954_v19 = vpop.f32.mrf.mxu1 }
 0x143   : > { %v1130_v39 = vadd.f32 %v1129_v59, %v1041_v46  ;;  %v955_v10 = vadd.f32 %v954_v19, %v865_v60  ;;  %v4072_v46 = vld [vmem:[#allocation2_spill] sm:$0xff] }
 0x144   : > { %1180 = vmatmul.bf16.gmra.mxu0 %v2892_v52 }
 0x145   : > { %v1557_v44 = vmax.f32 %v1130_v39, 0.0  ;;  %1269 = vmatmul.bf16.gmra.mxu1 %v2894_v53  ;;  %1358 = vmatmul.bf16.gmra.mxu2 %v2896_v54 }
 0x146   : > { %1447 = vmatmul.bf16.gmra.mxu3 %v2898_v55  ;;  %1718 = vmatpush.bf16.msra.mxu0 %v1595_v31 }
 0x147   : > { %v3527_v34 = vpack.c.bf16 %v1557_v44, %v1555_v36 }
 0x148   : > { %v1043_v18 = vpop.f32.mrf.mxu2 }
 0x149   : > { %v1044_v50 = vadd.f32 %v1043_v18, %v955_v10  ;;  %v1132_v63 = vpop.f32.mrf.mxu3  ;;  %v867_v21 = vpop.f32.mrf.mxu0  ;;  %v4074_v18 = vld [vmem:[#allocation4_spill] sm:$0xff] }
 0x14a   : > { %1719 = vmatpush.bf16.msra.mxu0 %v3313_v23  ;;  %v956_v61 = vpop.f32.mrf.mxu1 }
 0x14b   : > { %v1133_v52 = vadd.f32 %v1132_v63, %v1044_v50  ;;  %v957_v8 = vadd.f32 %v956_v61, %v867_v21  ;;  %v4075_v50 = vld [vmem:[#allocation5_spill] sm:$0xff]  ;;  %v4076_v63 = vld [vmem:[#allocation6_spill] sm:$0xff] }
 0x14d   : > { %v1559_v33 = vmax.f32 %v1133_v52, 0.0 }
 0x14e   : > { %1720 = vmatpush.bf16.msra.mxu0 %v3268_v5 }
 0x150   : > { %v1045_v37 = vpop.f32.mrf.mxu2 }
 0x151   : > { %v1046_v53 = vadd.f32 %v1045_v37, %v957_v8  ;;  %v1134_v47 = vpop.f32.mrf.mxu3  ;;  %v870_v54 = vpop.f32.mrf.mxu0 }
 0x152   : > { %1721 = vmatpush.bf16.msra.mxu0 %v3230_v51  ;;  %v959_v55 = vpop.f32.mrf.mxu1 }
 0x153   : > { %v1135_v9 = vadd.f32 %v1134_v47, %v1046_v53  ;;  %v960_v7 = vadd.f32 %v959_v55, %v870_v54  ;;  %v4077_v55 = vld [vmem:[#allocation7_spill] sm:$0xff] }
 0x154   : > { %1185 = vmatmul.bf16.gmra.mxu0 %v2928_v0 }
 0x155   : > { %v1561_v45 = vmax.f32 %v1135_v9, 0.0  ;;  %1274 = vmatmul.bf16.gmra.mxu1 %v2930_v1  ;;  %1363 = vmatmul.bf16.gmra.mxu2 %v2932_v2  ;;  %v4078_v9 = vld [vmem:[#allocation8_spill] sm:$0xff] }
 0x156   : > { %1452 = vmatmul.bf16.gmra.mxu3 %v2934_v3  ;;  %1722 = vmatpush.bf16.msra.mxu0 %v3192_v35 }
 0x157   : > { %v3537_v5 = vpack.c.bf16 %v1561_v45, %v1559_v33  ;;  %v4080_v33 = vld [vmem:[#allocation10_spill] sm:$0xff] }
 0x158   : > { %v1048_v23 = vpop.f32.mrf.mxu2 }
 0x159   : > { %v1049_v30 = vadd.f32 %v1048_v23, %v960_v7  ;;  %v1137_v51 = vpop.f32.mrf.mxu3  ;;  %v872_v16 = vpop.f32.mrf.mxu0  ;;  %v4079_v7 = vld [vmem:[#allocation9_spill] sm:$0xff] }
 0x15a   : > { %v961_v17 = vpop.f32.mrf.mxu1 }
 0x15b   : > { %v1138_v62 = vadd.f32 %v1137_v51, %v1049_v30  ;;  %v962_v11 = vadd.f32 %v961_v17, %v872_v16 }
 0x15d   : > { %v1563_v3 = vmax.f32 %v1138_v62, 0.0 }
 0x160   : > { %v1050_v0 = vpop.f32.mrf.mxu2 }
 0x161   : > { %v1051_v40 = vadd.f32 %v1050_v0, %v962_v11  ;;  %v1139_v49 = vpop.f32.mrf.mxu3  ;;  %v875_v29 = vpop.f32.mrf.mxu0  ;;  %v4081_v0 = vld [vmem:[#allocation11_spill] sm:$0xff] }
 0x162   : > { %v964_v1 = vpop.f32.mrf.mxu1 }
 0x163   : > { %v1140_v56 = vadd.f32 %v1139_v49, %v1051_v40  ;;  %v965_v2 = vadd.f32 %v964_v1, %v875_v29  ;;  %v4082_v40 = vld [vmem:[#allocation12_spill] sm:$0xff]  ;;  %v4083_v49 = vld [vmem:[#allocation13_spill] sm:$0xff]  ;;  %v4084_v29 = vld [vmem:[#allocation14_spill] sm:$0xff] }
 0x164   : > { %1190 = vmatmul.bf16.gmra.mxu0 %v2964_v12 }
 0x165   : > { %v1565_v35 = vmax.f32 %v1140_v56, 0.0  ;;  %1279 = vmatmul.bf16.gmra.mxu1 %v2966_v13  ;;  %1368 = vmatmul.bf16.gmra.mxu2 %v2968_v14 }
 0x166   : > { %1457 = vmatmul.bf16.gmra.mxu3 %v2970_v15 }
 0x167   : > { %v3543_v57 = vpack.c.bf16 %v1565_v35, %v1563_v3 }
 0x168   : > { %v1053_v58 = vpop.f32.mrf.mxu2 }
 0x169   : > { %v1054_v41 = vadd.f32 %v1053_v58, %v965_v2  ;;  %v1142_v42 = vpop.f32.mrf.mxu3  ;;  %v877_v28 = vpop.f32.mrf.mxu0 }
 0x16a   : > { %v966_v48 = vpop.f32.mrf.mxu1 }
 0x16b   : > { %v1143_v32 = vadd.f32 %v1142_v42, %v1054_v41  ;;  %v967_v4 = vadd.f32 %v966_v48, %v877_v28 }
 0x16d   : > { %v1567_v14 = vmax.f32 %v1143_v32, 0.0 }
 0x170   : > { %v1055_v43 = vpop.f32.mrf.mxu2 }
 0x171   : > { %v1056_v27 = vadd.f32 %v1055_v43, %v967_v4  ;;  %v1144_v12 = vpop.f32.mrf.mxu3  ;;  %v880_v38 = vpop.f32.mrf.mxu0 }
 0x172   : > { %v969_v20 = vpop.f32.mrf.mxu1 }
 0x173   : > { %v1145_v6 = vadd.f32 %v1144_v12, %v1056_v27  ;;  %v970_v13 = vadd.f32 %v969_v20, %v880_v38 }
 0x174   : > { %1195 = vmatmul.bf16.gmra.mxu0 %v3000_v24 }
 0x175   : > { %v1569_v15 = vmax.f32 %v1145_v6, 0.0  ;;  %1284 = vmatmul.bf16.gmra.mxu1 %v3002_v25  ;;  %1373 = vmatmul.bf16.gmra.mxu2 %v3004_v26  ;;  %v4073_v26 = vld [vmem:[#allocation3_spill] sm:$0xff] }
 0x176   : > { %1462 = vmatmul.bf16.gmra.mxu3 %v4072_v46 }
 0x177   : > { %v3549_v59 = vpack.c.bf16 %v1569_v15, %v1567_v14 }
 0x178   : > { %v1058_v60 = vpop.f32.mrf.mxu2 }
 0x179   : > { %v1059_v22 = vadd.f32 %v1058_v60, %v970_v13  ;;  %v1147_v19 = vpop.f32.mrf.mxu3  ;;  %v3551_v39 = vpop.f32.mrf.mxu0 }
 0x17a   : > { %v3553_v10 = vpop.f32.mrf.mxu1 }
 0x17b   : > { %v3555_v31 = vadd.f32 %v1147_v19, %v1059_v22  ;;  %v4085_v22 = vld [vmem:[#allocation15_spill] sm:$0xff] }
 0x180   : > { %v3557_v24 = vpop.f32.mrf.mxu2 }
 0x181   : > { %v3559_v36 = vpop.f32.mrf.mxu3  ;;  %v885_v25 = vpop.f32.mrf.mxu0 }
 0x182   : > { %v974_v44 = vpop.f32.mrf.mxu1 }
 0x183   : > { %v975_v32 = vadd.f32 %v974_v44, %v885_v25  ;;  %v4087_v25 = vld [vmem:[#allocation17_spill] sm:$0xff]  ;;  %v972_v44 = vadd.f32 %v3553_v10, %v3551_v39 }
 0x184   : > { %1200 = vmatmul.bf16.gmra.mxu0 %v4073_v26 }
 0x185   : > { %1289 = vmatmul.bf16.gmra.mxu1 %v4074_v18  ;;  %1378 = vmatmul.bf16.gmra.mxu2 %v4075_v50 }
 0x186   : > { %1467 = vmatmul.bf16.gmra.mxu3 %v4076_v63  ;;  %v4086_v63 = vld [vmem:[#allocation16_spill] sm:$0xff] }
 0x188   : > { %v1063_v21 = vpop.f32.mrf.mxu2 }
 0x189   : > { %v1152_v61 = vpop.f32.mrf.mxu3  ;;  %v887_v52 = vpop.f32.mrf.mxu0  ;;  %v1064_v19 = vadd.f32 %v1063_v21, %v975_v32 }
 0x18a   : > { %v976_v8 = vpop.f32.mrf.mxu1 }
 0x18b   : > { %v977_v43 = vadd.f32 %v976_v8, %v887_v52  ;;  %v4088_v52 = vld [vmem:[#allocation18_spill] sm:$0xff] }
 0x190   : > { %v1065_v37 = vpop.f32.mrf.mxu2 }
 0x191   : > { %v1154_v53 = vpop.f32.mrf.mxu3  ;;  %v890_v47 = vpop.f32.mrf.mxu0  ;;  %v1066_v14 = vadd.f32 %v1065_v37, %v977_v43 }
 0x192   : > { %v979_v54 = vpop.f32.mrf.mxu1 }
 0x193   : > { %v980_v58 = vadd.f32 %v979_v54, %v890_v47  ;;  %v1155_v8 = vadd.f32 %v1154_v53, %v1066_v14  ;;  %v1061_v54 = vadd.f32 %v3557_v24, %v972_v44 }
 0x194   : > { %1205 = vmatmul.bf16.gmra.mxu0 %v4077_v55 }
 0x195   : > { %1294 = vmatmul.bf16.gmra.mxu1 %v4078_v9  ;;  %1383 = vmatmul.bf16.gmra.mxu2 %v4079_v7  ;;  %v1153_v9 = vadd.f32 %v1152_v61, %v1064_v19  ;;  %v1150_v39 = vadd.f32 %v3559_v36, %v1061_v54  ;;  %v4090_v36 = vld [vmem:[#allocation20_spill] sm:$0xff] }
 0x196   : > { %1472 = vmatmul.bf16.gmra.mxu3 %v4080_v33  ;;  %v4094_v19 = vld [vmem:[#allocation24_spill] sm:$0xff] }
 0x197   : > { %v1575_v10 = vmax.f32 %v1153_v9, 0.0 }
 0x198   : > { %v1068_v45 = vpop.f32.mrf.mxu2 }
 0x199   : > { %v1157_v23 = vpop.f32.mrf.mxu3  ;;  %v892_v30 = vpop.f32.mrf.mxu0  ;;  %v1069_v27 = vadd.f32 %v1068_v45, %v980_v58  ;;  %v4091_v58 = vld [vmem:[#allocation21_spill] sm:$0xff] }
 0x19a   : > { %v981_v51 = vpop.f32.mrf.mxu1 }
 0x19b   : > { %v982_v41 = vadd.f32 %v981_v51, %v892_v30  ;;  %v1158_v26 = vadd.f32 %v1157_v23, %v1069_v27  ;;  %v1577_v30 = vmax.f32 %v1155_v8, 0.0 }
 0x19d   : > { %v1579_v21 = vmax.f32 %v1158_v26, 0.0  ;;  %v1613_v53 = vpack.c.bf16 %v1577_v30, %v1575_v10  ;;  %v4096_v26 = vld [vmem:[#allocation26_spill] sm:$0xff] }
 0x19e   : > { %v4100_v30 = vld [vmem:[#allocation30_spill] sm:$0xff] }
 0x1a0   : > { %v1070_v16 = vpop.f32.mrf.mxu2 }
 0x1a1   : > { %v1159_v17 = vpop.f32.mrf.mxu3  ;;  %v895_v62 = vpop.f32.mrf.mxu0  ;;  %v1071_v28 = vadd.f32 %v1070_v16, %v982_v41  ;;  %v4092_v41 = vld [vmem:[#allocation22_spill] sm:$0xff] }
 0x1a2   : > { %v984_v11 = vpop.f32.mrf.mxu1 }
 0x1a3   : > { %v985_v56 = vadd.f32 %v984_v11, %v895_v62  ;;  %v1160_v15 = vadd.f32 %v1159_v17, %v1071_v28  ;;  %v1573_v62 = vmax.f32 %v1150_v39, 0.0 }
 0x1a4   : > { %1210 = vmatmul.bf16.gmra.mxu0 %v4081_v0 }
 0x1a5   : > { %1299 = vmatmul.bf16.gmra.mxu1 %v4082_v40  ;;  %1388 = vmatmul.bf16.gmra.mxu2 %v4083_v49  ;;  %v1581_v37 = vmax.f32 %v1160_v15, 0.0  ;;  %v1571_v40 = vmax.f32 %v3555_v31, 0.0 }
 0x1a6   : > { %1477 = vmatmul.bf16.gmra.mxu3 %v4084_v29 }
 0x1a7   : > { %v1615_v17 = vpack.c.bf16 %v1581_v37, %v1579_v21 }
 0x1a8   : > { %v1073_v1 = vpop.f32.mrf.mxu2 }
 0x1a9   : > { %v1162_v2 = vpop.f32.mrf.mxu3  ;;  %v897_v3 = vpop.f32.mrf.mxu0  ;;  %v1074_v42 = vadd.f32 %v1073_v1, %v985_v56  ;;  %v4089_v56 = vld [vmem:[#allocation19_spill] sm:$0xff] }
 0x1aa   : > { %v986_v35 = vpop.f32.mrf.mxu1 }
 0x1ab   : > { %v987_v48 = vadd.f32 %v986_v35, %v897_v3  ;;  %v1163_v12 = vadd.f32 %v1162_v2, %v1074_v42  ;;  %v1611_v2 = vpack.c.bf16 %v1573_v62, %v1571_v40 }
 0x1ad   : > { %v1583_v18 = vmax.f32 %v1163_v12, 0.0 }
 0x1b0   : > { %v1075_v4 = vpop.f32.mrf.mxu2 }
 0x1b1   : > { %v1076_v38 = vadd.f32 %v1075_v4, %v987_v48  ;;  %v1164_v20 = vpop.f32.mrf.mxu3  ;;  %v1176_v6 = vpop.f32.mrf.mxu0 }
 0x1b2   : > { %v1265_v13 = vpop.f32.mrf.mxu1 }
 0x1b3   : > { %v1165_v46 = vadd.f32 %v1164_v20, %v1076_v38  ;;  %v1266_v60 = vadd.f32 %v1265_v13, %v1176_v6 }
 0x1b4   : > { %1215 = vmatmul.bf16.gmra.mxu0 %v4085_v22 }
 0x1b5   : > { %v1585_v50 = vmax.f32 %v1165_v46, 0.0  ;;  %1304 = vmatmul.bf16.gmra.mxu1 %v4086_v63  ;;  %1393 = vmatmul.bf16.gmra.mxu2 %v4087_v25  ;;  %v4093_v46 = vld [vmem:[#allocation23_spill] sm:$0xff] }
 0x1b6   : > { %1482 = vmatmul.bf16.gmra.mxu3 %v4088_v52 }
 0x1b7   : > { %v1617_v47 = vpack.c.bf16 %v1585_v50, %v1583_v18 }
 0x1b8   : > { %v1354_v55 = vpop.f32.mrf.mxu2 }
 0x1b9   : > { %v1355_v7 = vadd.f32 %v1354_v55, %v1266_v60  ;;  %v1443_v33 = vpop.f32.mrf.mxu3  ;;  %1764 = vmatpush.bf16.msra.mxu1 %v1617_v47  ;;  %v1178_v45 = vpop.f32.mrf.mxu0 }
 0x1ba   : > { %v1267_v23 = vpop.f32.mrf.mxu1 }
 0x1bb   : > { %v1444_v51 = vadd.f32 %v1443_v33, %v1355_v7  ;;  %v1268_v16 = vadd.f32 %v1267_v23, %v1178_v45  ;;  %v4097_v7 = vld [vmem:[#allocation27_spill] sm:$0xff]  ;;  %v4098_v45 = vld [vmem:[#allocation28_spill] sm:$0xff]  ;;  %v4099_v23 = vld [vmem:[#allocation29_spill] sm:$0xff] }
 0x1bd   : > { %1765 = vmatpush.bf16.msra.mxu1 %v1615_v17  ;;  %v1524_v3 = vmax.f32 %v1444_v51, 0.0 }
 0x1c0   : > { %v1356_v11 = vpop.f32.mrf.mxu2 }
 0x1c1   : > { %v1357_v24 = vadd.f32 %v1356_v11, %v1268_v16  ;;  %v1445_v0 = vpop.f32.mrf.mxu3  ;;  %1766 = vmatpush.bf16.msra.mxu1 %v1613_v53  ;;  %v1181_v61 = vpop.f32.mrf.mxu0 }
 0x1c2   : > { %v1270_v49 = vpop.f32.mrf.mxu1 }
 0x1c3   : > { %v1446_v29 = vadd.f32 %v1445_v0, %v1357_v24  ;;  %v1271_v1 = vadd.f32 %v1270_v49, %v1181_v61 }
 0x1c4   : > { %1220 = vmatmul.bf16.gmra.mxu0 %v4089_v56  ;;  %v4101_v56 = vld [vmem:[#allocation31_spill] sm:$0xff] }
 0x1c5   : > { %v1526_v35 = vmax.f32 %v1446_v29, 0.0  ;;  %1309 = vmatmul.bf16.gmra.mxu1 %v4090_v36  ;;  %1398 = vmatmul.bf16.gmra.mxu2 %v4091_v58  ;;  %v4103_v36 = vld [vmem:[#allocation33_spill] sm:$0xff]  ;;  %v4104_v58 = vld [vmem:[#allocation34_spill] sm:$0xff] }
 0x1c6   : > { %1487 = vmatmul.bf16.gmra.mxu3 %v4092_v41  ;;  %1767 = vmatpush.bf16.msra.mxu1 %v1611_v2 }
 0x1c7   : > { %v3586_v42 = vpack.c.bf16 %v1526_v35, %v1524_v3  ;;  %v4102_v35 = vld [vmem:[#allocation32_spill] sm:$0xff] }
 0x1c8   : > { %v1359_v28 = vpop.f32.mrf.mxu2 }
 0x1c9   : > { %v1360_v48 = vadd.f32 %v1359_v28, %v1271_v1  ;;  %v1448_v31 = vpop.f32.mrf.mxu3  ;;  %v1183_v32 = vpop.f32.mrf.mxu0 }
 0x1ca   : > { %1768 = vmatpush.bf16.msra.mxu1 %v3549_v59  ;;  %v1272_v4 = vpop.f32.mrf.mxu1  ;;  %v4095_v59 = vld [vmem:[#allocation25_spill] sm:$0xff] }
 0x1cb   : > { %v1449_v43 = vadd.f32 %v1448_v31, %v1360_v48  ;;  %v1273_v27 = vadd.f32 %v1272_v4, %v1183_v32 }
 0x1cd   : > { %v1528_v60 = vmax.f32 %v1449_v43, 0.0 }
 0x1ce   : > { %1769 = vmatpush.bf16.msra.mxu1 %v3543_v57 }
 0x1d0   : > { %v1361_v12 = vpop.f32.mrf.mxu2 }
 0x1d1   : > { %v1362_v38 = vadd.f32 %v1361_v12, %v1273_v27  ;;  %v1450_v20 = vpop.f32.mrf.mxu3  ;;  %v1186_v6 = vpop.f32.mrf.mxu0 }
 0x1d2   : > { %1770 = vmatpush.bf16.msra.mxu1 %v3537_v5  ;;  %v1275_v13 = vpop.f32.mrf.mxu1 }
 0x1d3   : > { %v1451_v14 = vadd.f32 %v1450_v20, %v1362_v38  ;;  %v1276_v15 = vadd.f32 %v1275_v13, %v1186_v6  ;;  %v4105_v6 = vld [vmem:[#allocation35_spill] sm:$0xff]  ;;  %v4106_v13 = vld [vmem:[#allocation36_spill] sm:$0xff] }
 0x1d4   : > { %1225 = vmatmul.bf16.gmra.mxu0 %v4093_v46 }
 0x1d5   : > { %v1530_v22 = vmax.f32 %v1451_v14, 0.0  ;;  %1314 = vmatmul.bf16.gmra.mxu1 %v4094_v19  ;;  %1403 = vmatmul.bf16.gmra.mxu2 %v4095_v59  ;;  %v4107_v14 = vld [vmem:[#allocation37_spill] sm:$0xff] }
 0x1d6   : > { %1492 = vmatmul.bf16.gmra.mxu3 %v4096_v26  ;;  %1771 = vmatpush.bf16.msra.mxu1 %v3527_v34 }
 0x1d7   : > { %v3596_v57 = vpack.c.bf16 %v1530_v22, %v1528_v60 }
 0x1d8   : > { %v1364_v18 = vpop.f32.mrf.mxu2 }
 0x1d9   : > { %v1365_v50 = vadd.f32 %v1364_v18, %v1276_v15  ;;  %v1453_v5 = vpop.f32.mrf.mxu3  ;;  %v1188_v63 = vpop.f32.mrf.mxu0  ;;  %v4108_v15 = vld [vmem:[#allocation38_spill] sm:$0xff] }
 0x1da   : > { %v1277_v25 = vpop.f32.mrf.mxu1 }
 0x1db   : > { %v1454_v44 = vadd.f32 %v1453_v5, %v1365_v50  ;;  %v1278_v52 = vadd.f32 %v1277_v25, %v1188_v63  ;;  %v4109_v5 = vld [vmem:[#allocation39_spill] sm:$0xff]  ;;  %v4110_v63 = vld [vmem:[#allocation40_spill] sm:$0xff]  ;;  %v4111_v25 = vld [vmem:[#allocation41_spill] sm:$0xff] }
 0x1dd   : > { %v1532_v33 = vmax.f32 %v1454_v44, 0.0  ;;  %v4112_v44 = vld [vmem:[#allocation42_spill] sm:$0xff] }
 0x1e0   : > { %v1366_v8 = vpop.f32.mrf.mxu2 }
 0x1e1   : > { %v1367_v37 = vadd.f32 %v1366_v8, %v1278_v52  ;;  %v1455_v47 = vpop.f32.mrf.mxu3  ;;  %v1191_v54 = vpop.f32.mrf.mxu0 }
 0x1e2   : > { %v1280_v55 = vpop.f32.mrf.mxu1 }
 0x1e3   : > { %v1456_v9 = vadd.f32 %v1455_v47, %v1367_v37  ;;  %v1281_v21 = vadd.f32 %v1280_v55, %v1191_v54 }
 0x1e4   : > { %1230 = vmatmul.bf16.gmra.mxu0 %v4097_v7  ;;  %v4113_v7 = vld [vmem:[#allocation43_spill] sm:$0xff] }
 0x1e5   : > { %v1534_v34 = vmax.f32 %v1456_v9, 0.0  ;;  %1319 = vmatmul.bf16.gmra.mxu1 %v4098_v45  ;;  %1408 = vmatmul.bf16.gmra.mxu2 %v4099_v23  ;;  %v4116_v45 = vld [vmem:[#allocation46_spill] sm:$0xff] }
 0x1e6   : > { %1497 = vmatmul.bf16.gmra.mxu3 %v4100_v30 }
 0x1e7   : > { %v3602_v51 = vpack.c.bf16 %v1534_v34, %v1532_v33  ;;  %v4114_v33 = vld [vmem:[#allocation44_spill] sm:$0xff]  ;;  %v4115_v34 = vld [vmem:[#allocation45_spill] sm:$0xff] }
 0x1e8   : > { %v1369_v16 = vpop.f32.mrf.mxu2 }
 0x1e9   : > { %v1370_v17 = vadd.f32 %v1369_v16, %v1281_v21  ;;  %v1458_v39 = vpop.f32.mrf.mxu3  ;;  %v1193_v10 = vpop.f32.mrf.mxu0 }
 0x1ea   : > { %v1282_v53 = vpop.f32.mrf.mxu1 }
 0x1eb   : > { %v1459_v62 = vadd.f32 %v1458_v39, %v1370_v17  ;;  %v1283_v11 = vadd.f32 %v1282_v53, %v1193_v10 }
 0x1ed   : > { %v1536_v2 = vmax.f32 %v1459_v62, 0.0 }
 0x1f0   : > { %v1371_v24 = vpop.f32.mrf.mxu2 }
 0x1f1   : > { %v1372_v0 = vadd.f32 %v1371_v24, %v1283_v11  ;;  %v1460_v61 = vpop.f32.mrf.mxu3  ;;  %v1196_v40 = vpop.f32.mrf.mxu0 }
 0x1f2   : > { %v1285_v49 = vpop.f32.mrf.mxu1 }
 0x1f3   : > { %v1461_v29 = vadd.f32 %v1460_v61, %v1372_v0  ;;  %v1286_v1 = vadd.f32 %v1285_v49, %v1196_v40 }
 0x1f4   : > { %1235 = vmatmul.bf16.gmra.mxu0 %v4101_v56 }
 0x1f5   : > { %v1538_v3 = vmax.f32 %v1461_v29, 0.0  ;;  %1324 = vmatmul.bf16.gmra.mxu1 %v4102_v35  ;;  %1413 = vmatmul.bf16.gmra.mxu2 %v4103_v36 }
 0x1f6   : > { %1502 = vmatmul.bf16.gmra.mxu3 %v4104_v58 }
 0x1f7   : > { %v3608_v41 = vpack.c.bf16 %v1538_v3, %v1536_v2 }
 0x1f8   : > { %v1374_v28 = vpop.f32.mrf.mxu2 }
 0x1f9   : > { %v1375_v48 = vadd.f32 %v1374_v28, %v1286_v1  ;;  %v1463_v31 = vpop.f32.mrf.mxu3  ;;  %v1198_v32 = vpop.f32.mrf.mxu0 }
 0x1fa   : > { %v1287_v4 = vpop.f32.mrf.mxu1 }
 0x1fb   : > { %v3610_v43 = vadd.f32 %v1463_v31, %v1375_v48  ;;  %v1288_v48 = vadd.f32 %v1287_v4, %v1198_v32 }
 0x200   : > { %v1376_v27 = vpop.f32.mrf.mxu2 }
 0x201   : > { %v3612_v12 = vpop.f32.mrf.mxu3  ;;  %v1201_v38 = vpop.f32.mrf.mxu0 }
 0x202   : > { %v1290_v20 = vpop.f32.mrf.mxu1 }
 0x203   : > { %v1291_v0 = vadd.f32 %v1290_v20, %v1201_v38 }
 0x204   : > { %1240 = vmatmul.bf16.gmra.mxu0 %v4105_v6 }
 0x205   : > { %1329 = vmatmul.bf16.gmra.mxu1 %v4106_v13  ;;  %1418 = vmatmul.bf16.gmra.mxu2 %v4107_v14 }
 0x206   : > { %1507 = vmatmul.bf16.gmra.mxu3 %v4108_v15  ;;  %v1377_v15 = vadd.f32 %v1376_v27, %v1288_v48 }
 0x208   : > { %v1379_v46 = vpop.f32.mrf.mxu2  ;;  %v1466_v32 = vadd.f32 %v3612_v12, %v1377_v15 }
 0x209   : > { %v1468_v60 = vpop.f32.mrf.mxu3  ;;  %v1203_v22 = vpop.f32.mrf.mxu0  ;;  %v1380_v31 = vadd.f32 %v1379_v46, %v1291_v0 }
 0x20a   : > { %v1292_v19 = vpop.f32.mrf.mxu1 }
 0x20b   : > { %v1293_v40 = vadd.f32 %v1292_v19, %v1203_v22  ;;  %v1469_v19 = vadd.f32 %v1468_v60, %v1380_v31  ;;  %v1540_v60 = vmax.f32 %v3610_v43, 0.0  ;;  %v2509_v43 = vld [vmem:[%s3979_s2] sm:$0xf] }
 0x20d   : > { %v1544_v27 = vmax.f32 %v1469_v19, 0.0 }
 0x210   : > { %v1381_v59 = vpop.f32.mrf.mxu2 }
 0x211   : > { %v1470_v26 = vpop.f32.mrf.mxu3  ;;  %v1206_v18 = vpop.f32.mrf.mxu0  ;;  %v1382_v35 = vadd.f32 %v1381_v59, %v1293_v40 }
 0x212   : > { %v1295_v50 = vpop.f32.mrf.mxu1 }
 0x213   : > { %v1296_v10 = vadd.f32 %v1295_v50, %v1206_v18  ;;  %v1471_v18 = vadd.f32 %v1470_v26, %v1382_v35  ;;  %v1542_v26 = vmax.f32 %v1466_v32, 0.0 }
 0x214   : > { %1245 = vmatmul.bf16.gmra.mxu0 %v4109_v5 }
 0x215   : > { %1334 = vmatmul.bf16.gmra.mxu1 %v4110_v63  ;;  %1423 = vmatmul.bf16.gmra.mxu2 %v4111_v25  ;;  %v1546_v4 = vmax.f32 %v1471_v18, 0.0  ;;  %v2525_v18 = vld [vmem:[%s3979_s2 + $0x20] sm:$0xf] }
 0x216   : > { %1512 = vmatmul.bf16.gmra.mxu3 %v4112_v44 }
 0x218   : > { %v1384_v52 = vpop.f32.mrf.mxu2 }
 0x219   : > { %v1473_v8 = vpop.f32.mrf.mxu3  ;;  %v1208_v37 = vpop.f32.mrf.mxu0  ;;  %v1385_v49 = vadd.f32 %v1384_v52, %v1296_v10  ;;  %v1598_v52 = vpack.c.bf16 %v1546_v4, %v1544_v27 }
 0x21a   : > { %v1297_v47 = vpop.f32.mrf.mxu1 }
 0x21b   : > { %v1298_v53 = vadd.f32 %v1297_v47, %v1208_v37  ;;  %v1474_v6 = vadd.f32 %v1473_v8, %v1385_v49 }
 0x21d   : > { %v1548_v50 = vmax.f32 %v1474_v6, 0.0 }
 0x220   : > { %v1386_v54 = vpop.f32.mrf.mxu2 }
 0x221   : > { %v1475_v55 = vpop.f32.mrf.mxu3  ;;  %v1211_v9 = vpop.f32.mrf.mxu0  ;;  %v1387_v11 = vadd.f32 %v1386_v54, %v1298_v53 }
 0x222   : > { %v1300_v21 = vpop.f32.mrf.mxu1 }
 0x223   : > { %v1301_v30 = vadd.f32 %v1300_v21, %v1211_v9  ;;  %v1476_v36 = vadd.f32 %v1475_v55, %v1387_v11  ;;  %v1596_v9 = vpack.c.bf16 %v1542_v26, %v1540_v60 }
 0x224   : > { %1250 = vmatmul.bf16.gmra.mxu0 %v4113_v7 }
 0x225   : > { %1339 = vmatmul.bf16.gmra.mxu1 %v4114_v33  ;;  %1428 = vmatmul.bf16.gmra.mxu2 %v4115_v34  ;;  %v1550_v38 = vmax.f32 %v1476_v36, 0.0 }
 0x226   : > { %1517 = vmatmul.bf16.gmra.mxu3 %v4116_v45 }
 0x227   : > { %v1600_v44 = vpack.c.bf16 %v1550_v38, %v1548_v50  ;;  %v2645_v38 = vld [vmem:[%s3979_s2 + $0x24] sm:$0xf0]  ;;  %v2527_v50 = vld [vmem:[%s3979_s2 + $0x28] sm:$0xf0] }
 0x228   : > { %v1389_v23 = vpop.f32.mrf.mxu2  ;;  %v2526_v19 = vor.u32 %v2645_v38, %v2525_v18  ;;  %v2549_v38 = vld [vmem:[%s3979_s2 + $0x50] sm:$0xf] }
 0x229   : > { %v1478_v16 = vpop.f32.mrf.mxu3  ;;  %v1213_v17 = vpop.f32.mrf.mxu0  ;;  %v1390_v62 = vadd.f32 %v1389_v23, %v1301_v30  ;;  %v2641_v23 = vld [vmem:[%s3979_s2 + $0x4] sm:$0xf0] }
 0x22a   : > { %v1302_v39 = vpop.f32.mrf.mxu1 }
 0x22b   : > { %v1303_v24 = vadd.f32 %v1302_v39, %v1213_v17  ;;  %v1479_v29 = vadd.f32 %v1478_v16, %v1390_v62  ;;  %v2510_v16 = vor.u32 %v2641_v23, %v2509_v43  ;;  %v2511_v17 = vld [vmem:[%s3979_s2 + $0x8] sm:$0xf0]  ;;  %v2535_v43 = vld [vmem:[%s3979_s2 + $0x38] sm:$0xf0] }
 0x22d   : > { %v1552_v13 = vmax.f32 %v1479_v29, 0.0  ;;  %v2643_v29 = vld [vmem:[%s3979_s2 + $0x14] sm:$0xf0] }
 0x230   : > { %v1391_v61 = vpop.f32.mrf.mxu2 }
 0x231   : > { %v1392_v1 = vadd.f32 %v1391_v61, %v1303_v24  ;;  %v1480_v56 = vpop.f32.mrf.mxu3  ;;  %v1216_v2 = vpop.f32.mrf.mxu0 }
 0x232   : > { %v1305_v3 = vpop.f32.mrf.mxu1 }
 0x233   : > { %v1481_v58 = vadd.f32 %v1480_v56, %v1392_v1  ;;  %v1306_v28 = vadd.f32 %v1305_v3, %v1216_v2  ;;  %v2519_v2 = vld [vmem:[%s3979_s2 + $0x18] sm:$0xf0] }
 0x234   : > { %1723 = vmatmul.bf16.vlgmr.msra.gmra.mxu0 %v2510_v16 }
 0x235   : > { %v1554_v14 = vmax.f32 %v1481_v58, 0.0 }
 0x237   : > { %v1602_v20 = vpack.c.bf16 %v1554_v14, %v1552_v13 }
 0x238   : > { %v1394_v22 = vpop.f32.mrf.mxu2 }
 0x239   : > { %v1395_v5 = vadd.f32 %v1394_v22, %v1306_v28  ;;  %v1483_v63 = vpop.f32.mrf.mxu3  ;;  %1813 = vmatpush.bf16.msra.mxu2 %v1602_v20  ;;  %v3626_v25 = vpop.f32.mrf.mxu0  ;;  %v2644_v20 = vld [vmem:[%s3979_s2 + $0x24] sm:$0xf] }
 0x23a   : > { %v3628_v59 = vpop.f32.mrf.mxu1  ;;  %v3714_v32 = vor.u32 %v2644_v20, %v2527_v50  ;;  %v2651_v20 = vld [vmem:[%s3979_s2 + $0x54] sm:$0xf0] }
 0x23b   : > { %v3631_v46 = vadd.f32 %v1483_v63, %v1395_v5 }
 0x23d   : > { %1814 = vmatpush.bf16.msra.mxu2 %v1600_v44 }
 0x240   : > { %v3633_v8 = vpop.f32.mrf.mxu2 }
 0x241   : > { %v3636_v37 = vpop.f32.mrf.mxu3  ;;  %1815 = vmatpush.bf16.msra.mxu2 %v1598_v52  ;;  %v1221_v47 = vpop.f32.mrf.mxu0 }
 0x242   : > { %v1310_v54 = vpop.f32.mrf.mxu1 }
 0x243   : > { %v1311_v55 = vadd.f32 %v1310_v54, %v1221_v47 }
 0x245   : > { %1816 = vmatpush.bf16.msra.mxu2 %v1596_v9  ;;  %v2647_v9 = vld [vmem:[%s3979_s2 + $0x34] sm:$0xf0] }
 0x248   : > { %v1399_v12 = vpop.f32.mrf.mxu2 }
 0x249   : > { %v1400_v21 = vadd.f32 %v1399_v12, %v1311_v55  ;;  %v1488_v7 = vpop.f32.mrf.mxu3  ;;  %1817 = vmatpush.bf16.msra.mxu2 %v3608_v41  ;;  %v3639_v33 = vpop.f32.mrf.mxu0  ;;  %v2640_v41 = vld [vmem:[%s3979_s2 + $0x4] sm:$0xf]  ;;  %v2533_v55 = vld [vmem:[%s3979_s2 + $0x30] sm:$0xf]  ;;  %v2646_v12 = vld [vmem:[%s3979_s2 + $0x34] sm:$0xf] }
 0x24a   : > { %v3641_v34 = vpop.f32.mrf.mxu1  ;;  %v3663_v10 = vor.u32 %v2640_v41, %v2511_v17 }
 0x24b   : > { %v3643_v45 = vadd.f32 %v1488_v7, %v1400_v21  ;;  %v2534_v7 = vor.u32 %v2647_v9, %v2533_v55 }
 0x24c   : > { %1772 = vmatmul.bf16.vlgmr.msra.gmra.mxu1 %v3663_v10 }
 0x24d   : > { %1818 = vmatpush.bf16.msra.mxu2 %v3602_v51 }
 0x250   : > { %v3655_v30 = vpop.f32.mrf.mxu2 }
 0x251   : > { %v3660_v51 = vpop.f32.mrf.mxu3  ;;  %1819 = vmatpush.bf16.msra.mxu2 %v3596_v57  ;;  %v1226_v39 = vpop.f32.mrf.mxu0  ;;  %v2517_v57 = vld [vmem:[%s3979_s2 + $0x10] sm:$0xf] }
 0x252   : > { %v1315_v53 = vpop.f32.mrf.mxu1  ;;  %v2518_v56 = vor.u32 %v2643_v29, %v2517_v57  ;;  %v2648_v57 = vld [vmem:[%s3979_s2 + $0x44] sm:$0xf] }
 0x253   : > { %v1316_v62 = vadd.f32 %v1315_v53, %v1226_v39 }
 0x254   : > { %1728 = vmatmul.bf16.gmra.mxu0 %v2518_v56 }
 0x255   : > { %1820 = vmatpush.bf16.msra.mxu2 %v3586_v42  ;;  %v2642_v42 = vld [vmem:[%s3979_s2 + $0x14] sm:$0xf] }
 0x256   : > { %v3689_v36 = vor.u32 %v2642_v42, %v2519_v2 }
 0x258   : > { %v1404_v11 = vpop.f32.mrf.mxu2  ;;  %1821 = vmatmul.bf16.vlgmr.msra.gmra.mxu2 %v2510_v16  ;;  %v3739_v16 = vor.u32 %v2646_v12, %v2535_v43 }
 0x259   : > { %v1405_v24 = vadd.f32 %v1404_v11, %v1316_v62  ;;  %v1493_v0 = vpop.f32.mrf.mxu3  ;;  %v3667_v61 = vpop.f32.mrf.mxu0 }
 0x25a   : > { %v3669_v40 = vpop.f32.mrf.mxu1 }
 0x25b   : > { %v3671_v49 = vadd.f32 %v1493_v0, %v1405_v24  ;;  %v2541_v24 = vld [vmem:[%s3979_s2 + $0x40] sm:$0xf]  ;;  %v2649_v0 = vld [vmem:[%s3979_s2 + $0x44] sm:$0xf0] }
 0x25c   : > { %1777 = vmatmul.bf16.gmra.mxu1 %v3689_v36  ;;  %v2542_v42 = vor.u32 %v2649_v0, %v2541_v24 }
 0x260   : > { %v3682_v1 = vpop.f32.mrf.mxu2 }
 0x261   : > { %v3687_v3 = vpop.f32.mrf.mxu3  ;;  %v1231_v35 = vpop.f32.mrf.mxu0 }
 0x262   : > { %v1320_v58 = vpop.f32.mrf.mxu1 }
 0x263   : > { %v1321_v28 = vadd.f32 %v1320_v58, %v1231_v35 }
 0x264   : > { %1733 = vmatmul.bf16.gmra.mxu0 %v2526_v19 }
 0x268   : > { %v1409_v48 = vpop.f32.mrf.mxu2  ;;  %1826 = vmatmul.bf16.gmra.mxu2 %v2518_v56  ;;  %v2543_v56 = vld [vmem:[%s3979_s2 + $0x48] sm:$0xf0] }
 0x269   : > { %v1410_v31 = vadd.f32 %v1409_v48, %v1321_v28  ;;  %v1498_v6 = vpop.f32.mrf.mxu3  ;;  %v3692_v13 = vpop.f32.mrf.mxu0  ;;  %v3760_v58 = vor.u32 %v2648_v57, %v2543_v56 }
 0x26a   : > { %v3694_v14 = vpop.f32.mrf.mxu1 }
 0x26b   : > { %v3696_v15 = vadd.f32 %v1498_v6, %v1410_v31 }
 0x26c   : > { %1782 = vmatmul.bf16.gmra.mxu1 %v3714_v32 }
 0x270   : > { %v3707_v22 = vpop.f32.mrf.mxu2 }
 0x271   : > { %v3712_v5 = vpop.f32.mrf.mxu3  ;;  %v1236_v63 = vpop.f32.mrf.mxu0 }
 0x272   : > { %v1325_v4 = vpop.f32.mrf.mxu1 }
 0x273   : > { %v1326_v44 = vadd.f32 %v1325_v4, %v1236_v63  ;;  %v2550_v63 = vor.u32 %v2651_v20, %v2549_v38  ;;  %v2551_v4 = vld [vmem:[%s3979_s2 + $0x58] sm:$0xf0]  ;;  %v2557_v20 = vld [vmem:[%s3979_s2 + $0x60] sm:$0xf] }
 0x274   : > { %1738 = vmatmul.bf16.gmra.mxu0 %v2534_v7 }
 0x278   : > { %v1414_v27 = vpop.f32.mrf.mxu2  ;;  %1831 = vmatmul.bf16.gmra.mxu2 %v2526_v19  ;;  %v2650_v19 = vld [vmem:[%s3979_s2 + $0x54] sm:$0xf] }
 0x279   : > { %v1415_v26 = vadd.f32 %v1414_v27, %v1326_v44  ;;  %v1503_v52 = vpop.f32.mrf.mxu3  ;;  %v3717_v60 = vpop.f32.mrf.mxu0  ;;  %v3775_v27 = vor.u32 %v2650_v19, %v2551_v4  ;;  %v2653_v19 = vld [vmem:[%s3979_s2 + $0x64] sm:$0xf0] }
 0x27a   : > { %v3719_v47 = vpop.f32.mrf.mxu1 }
 0x27b   : > { %v3721_v54 = vadd.f32 %v1503_v52, %v1415_v26 }
 0x27c   : > { %1787 = vmatmul.bf16.gmra.mxu1 %v3739_v16 }
 0x280   : > { %v3732_v21 = vpop.f32.mrf.mxu2 }
 0x281   : > { %v3737_v23 = vpop.f32.mrf.mxu3  ;;  %v1241_v41 = vpop.f32.mrf.mxu0 }
 0x282   : > { %v1330_v17 = vpop.f32.mrf.mxu1 }
 0x284   : > { %1743 = vmatmul.bf16.gmra.mxu0 %v2542_v42 }
 0x288   : > { %v3742_v39 = vpop.f32.mrf.mxu2  ;;  %1836 = vmatmul.bf16.gmra.mxu2 %v2534_v7 }
 0x289   : > { %v3744_v53 = vpop.f32.mrf.mxu3  ;;  %v1243_v62 = vpop.f32.mrf.mxu0 }
 0x28a   : > { %v1332_v11 = vpop.f32.mrf.mxu1 }
 0x28c   : > { %1792 = vmatmul.bf16.gmra.mxu1 %v3760_v58 }
 0x290   : > { %v1421_v29 = vpop.f32.mrf.mxu2 }
 0x291   : > { %v3758_v2 = vpop.f32.mrf.mxu3  ;;  %v1246_v35 = vpop.f32.mrf.mxu0 }
 0x292   : > { %v1335_v28 = vpop.f32.mrf.mxu1 }
 0x293   : > { %v1336_v7 = vadd.f32 %v1335_v28, %v1246_v35  ;;  %v1333_v35 = vadd.f32 %v1332_v11, %v1243_v62 }
 0x294   : > { %1748 = vmatmul.bf16.gmra.mxu0 %v2550_v63 }
 0x295   : > { %v1422_v62 = vadd.f32 %v1421_v29, %v1333_v35  ;;  %v2655_v35 = vld [vmem:[%s3979_s2 + $0x74] sm:$0xf0] }
 0x298   : > { %v1424_v48 = vpop.f32.mrf.mxu2  ;;  %1841 = vmatmul.bf16.gmra.mxu2 %v2542_v42  ;;  %v1331_v42 = vadd.f32 %v1330_v17, %v1241_v41  ;;  %v2559_v41 = vld [vmem:[%s3979_s2 + $0x68] sm:$0xf0]  ;;  %v1943_v17 = vld [vmem:[%s3980_s3] sm:$0xff] }
 0x299   : > { %v1513_v31 = vpop.f32.mrf.mxu3  ;;  %v1248_v6 = vpop.f32.mrf.mxu0  ;;  %v1425_v28 = vadd.f32 %v1424_v48, %v1336_v7 }
 0x29a   : > { %v1337_v18 = vpop.f32.mrf.mxu1  ;;  %v1420_v7 = vadd.f32 %v3742_v39, %v1331_v42 }
 0x29b   : > { %v1338_v0 = vadd.f32 %v1337_v18, %v1248_v6  ;;  %v2558_v6 = vor.u32 %v2653_v19, %v2557_v20  ;;  %v1946_v20 = vld [vmem:[%s3980_s3 + $0x18] sm:$0xff]  ;;  %v1318_v19 = vadd.f32 %v3669_v40, %v3667_v61  ;;  %v2654_v61 = vld [vmem:[%s3979_s2 + $0x74] sm:$0xf] }
 0x29c   : > { %1797 = vmatmul.bf16.gmra.mxu1 %v3775_v27  ;;  %v1509_v39 = vadd.f32 %v3744_v53, %v1420_v7 }
 0x2a0   : > { %v1426_v50 = vpop.f32.mrf.mxu2 }
 0x2a1   : > { %v1515_v44 = vpop.f32.mrf.mxu3  ;;  %v1251_v26 = vpop.f32.mrf.mxu0  ;;  %v1427_v56 = vadd.f32 %v1426_v50, %v1338_v0 }
 0x2a2   : > { %v1340_v52 = vpop.f32.mrf.mxu1 }
 0x2a3   : > { %v1341_v9 = vadd.f32 %v1340_v52, %v1251_v26  ;;  %v2716_v52 = vmov 0   ;;  %v1516_v11 = vadd.f32 %v1515_v44, %v1427_v56  ;;  %v1511_v44 = vadd.f32 %v3758_v2, %v1422_v62  ;;  %v1952_v62 = vld [vmem:[%s3980_s3 + $0x48] sm:$0xff] }
 0x2a4   : > { %2681 = vset.pattern.permute.xlu0 %v2716_v52  ;;  %2682 = vset.pattern.permute.xlu1 %v2716_v52 }
 0x2a5   : > { %1961 = vperm.xlu0 %2681, %v1943_v17   ;;  %1753 = vmatmul.bf16.gmra.mxu0 %v2558_v6  ;;  %v1578_v2 = vmax.f32 %v1511_v44, 0.0 }
 0x2a6   : > { %2683 = vset.pattern.permute.xlu2 %v2716_v52  ;;  %v1950_v52 = vld [vmem:[%s3980_s3 + $0x38] sm:$0xff] }
 0x2a8   : > { %v1429_v55 = vpop.f32.mrf.mxu2  ;;  %1846 = vmatmul.bf16.gmra.mxu2 %v2550_v63  ;;  %v2652_v63 = vld [vmem:[%s3979_s2 + $0x64] sm:$0xf] }
 0x2a9   : > { %v1518_v12 = vpop.f32.mrf.mxu3  ;;  %v1253_v43 = vpop.f32.mrf.mxu0  ;;  %v1430_v57 = vadd.f32 %v1429_v55, %v1341_v9  ;;  %v3793_v26 = vor.u32 %v2652_v63, %v2559_v41  ;;  %v1328_v9 = vadd.f32 %v3719_v47, %v3717_v60  ;;  %v1944_v60 = vld [vmem:[%s3980_s3 + $0x8] sm:$0xff]  ;;  %v1323_v47 = vadd.f32 %v3694_v14, %v3692_v13 }
 0x2aa   : > { %v1342_v24 = vpop.f32.mrf.mxu1  ;;  %v1576_v63 = vmax.f32 %v1509_v39, 0.0  ;;  %v1407_v14 = vadd.f32 %v3682_v1, %v1318_v19  ;;  %v2567_v1 = vld [vmem:[%s3979_s2 + $0x78] sm:$0xf0] }
 0x2ab   : > { %v1343_v38 = vadd.f32 %v1342_v24, %v1253_v43  ;;  %v1519_v18 = vadd.f32 %v1518_v12, %v1430_v57  ;;  %v1945_v12 = vld [vmem:[%s3980_s3 + $0x10] sm:$0xff]  ;;  %v1514_v43 = vadd.f32 %v1513_v31, %v1425_v28  ;;  %v1417_v29 = vadd.f32 %v3732_v21, %v1328_v9 }
 0x2ac   : > { %1802 = vmatmul.bf16.gmra.mxu1 %v3793_v26  ;;  %1971 = vperm.xlu1 %2682, %v1945_v12   ;;  %v1582_v57 = vmax.f32 %v1516_v11, 0.0  ;;  %v1412_v21 = vadd.f32 %v3707_v22, %v1323_v47  ;;  %v1614_v53 = vpack.c.bf16 %v1578_v2, %v1576_v63  ;;  %v2565_v22 = vld [vmem:[%s3979_s2 + $0x70] sm:$0xf]  ;;  %v1313_v28 = vadd.f32 %v3641_v34, %v3639_v33 }
 0x2ad   : > { %v1584_v24 = vmax.f32 %v1519_v18, 0.0  ;;  %v1580_v31 = vmax.f32 %v1514_v43, 0.0  ;;  %v1506_v42 = vadd.f32 %v3737_v23, %v1417_v29  ;;  %1966 = vperm.xlu0 %2681, %v1944_v60   ;;  %v2566_v40 = vor.u32 %v2655_v35, %v2565_v22  ;;  %v1948_v43 = vld [vmem:[%s3980_s3 + $0x28] sm:$0xff] }
 0x2ae   : > { %v1501_v23 = vadd.f32 %v3712_v5, %v1412_v21  ;;  %v1949_v5 = vld [vmem:[%s3980_s3 + $0x30] sm:$0xff]  ;;  %v1402_v41 = vadd.f32 %v3655_v30, %v1313_v28  ;;  %v1496_v17 = vadd.f32 %v3687_v3, %v1407_v14  ;;  %v1308_v33 = vadd.f32 %v3628_v59, %v3626_v25 }
 0x2af   : > { %v1574_v13 = vmax.f32 %v1506_v42, 0.0  ;;  %v1568_v34 = vmax.f32 %v3696_v15, 0.0  ;;  %v1564_v11 = vmax.f32 %v3671_v49, 0.0  ;;  %v1556_v12 = vmax.f32 %v3631_v46, 0.0  ;;  %v1958_v46 = vld [vmem:[%s3980_s3 + $0x78] sm:$0xff] }
 0x2b0   : > { %v1431_v4 = vpop.f32.mrf.mxu2  ;;  %v1570_v18 = vmax.f32 %v1501_v23, 0.0  ;;  %v1491_v30 = vadd.f32 %v3660_v51, %v1402_v41  ;;  %v1566_v3 = vmax.f32 %v1496_v17, 0.0  ;;  %v1560_v51 = vmax.f32 %v3643_v45, 0.0  ;;  %v1956_v45 = vld [vmem:[%s3980_s3 + $0x68] sm:$0xff] }
 0x2b1   : > { %v1432_v50 = vadd.f32 %v1431_v4, %v1343_v38  ;;  %v1520_v55 = vpop.f32.mrf.mxu3  ;;  %v1616_v38 = vpack.c.bf16 %v1582_v57, %v1580_v31  ;;  %v1572_v4 = vmax.f32 %v3721_v54, 0.0  ;;  %v1397_v54 = vadd.f32 %v3633_v8, %v1308_v33  ;;  %v1953_v8 = vld [vmem:[%s3980_s3 + $0x50] sm:$0xff]  ;;  %v1724_v29 = vpop.f32.mrf.mxu0 }
 0x2b2   : > { %v1562_v59 = vmax.f32 %v1491_v30, 0.0  ;;  %v1608_v15 = vpack.c.bf16 %v1566_v3, %v1564_v11 }
 0x2b3   : > { %v1521_v48 = vadd.f32 %v1520_v55, %v1432_v50  ;;  %v1612_v50 = vpack.c.bf16 %v1574_v13, %v1572_v4  ;;  %v1610_v55 = vpack.c.bf16 %v1570_v18, %v1568_v34  ;;  %v1486_v25 = vadd.f32 %v3636_v37, %v1397_v54  ;;  %v1955_v37 = vld [vmem:[%s3980_s3 + $0x60] sm:$0xff] }
 0x2b4   : > { %1976 = vperm.xlu1 %2682, %v1946_v20   ;;  %v1606_v49 = vpack.c.bf16 %v1562_v59, %v1560_v51 }
 0x2b5   : > { %v1586_v0 = vmax.f32 %v1521_v48, 0.0  ;;  %1991 = vperm.xlu0 %2681, %v1949_v5   ;;  %1758 = vmatmul.bf16.gmra.mxu0 %v2566_v40  ;;  %v1947_v48 = vld [vmem:[%s3980_s3 + $0x20] sm:$0xff]  ;;  %v1558_v9 = vmax.f32 %v1486_v25, 0.0 }
 0x2b6   : > { %1981 = vperm.xlu2 %2683, %v1947_v48  }
 0x2b7   : > { %v1618_v56 = vpack.c.bf16 %v1586_v0, %v1584_v24  ;;  %v1604_v7 = vpack.c.bf16 %v1558_v9, %v1556_v12  ;;  %v1951_v24 = vld [vmem:[%s3980_s3 + $0x40] sm:$0xff]  ;;  %v1954_v0 = vld [vmem:[%s3980_s3 + $0x58] sm:$0xff] }
 0x2b8   : > { %1851 = vmatmul.bf16.gmra.mxu2 %v2558_v6  ;;  %v3837_v6 = vor.u32 %v2654_v61, %v2567_v1 }
 0x2b9   : > { %1862 = vmatpush.bf16.msra.mxu3 %v1618_v56  ;;  %v1726_v57 = vpop.f32.mrf.mxu0 }
 0x2bc   : > { %1807 = vmatmul.bf16.gmra.mxu1 %v3837_v6  ;;  %1996 = vperm.xlu1 %2682, %v1950_v52  }
 0x2bd   : > { %1863 = vmatpush.bf16.msra.mxu3 %v1616_v38  ;;  %2006 = vperm.xlu0 %2681, %v1952_v62  }
 0x2be   : > { %1986 = vperm.xlu2 %2683, %v1948_v43  }
 0x2c1   : > { %1864 = vmatpush.bf16.msra.mxu3 %v1614_v53 }
 0x2c4   : > { %2011 = vperm.xlu1 %2682, %v1953_v8  }
 0x2c5   : > { %1865 = vmatpush.bf16.msra.mxu3 %v1612_v50  ;;  %2021 = vperm.xlu0 %2681, %v1955_v37  }
 0x2c6   : > { %2001 = vperm.xlu2 %2683, %v1951_v24  }
 0x2c8   : > { %1856 = vmatmul.bf16.gmra.mxu2 %v2566_v40 }
 0x2c9   : > { %1866 = vmatpush.bf16.msra.mxu3 %v1610_v55  ;;  %v1773_v44 = vpop.f32.mrf.mxu1 }
 0x2ca   : > { %v1774_v21 = vadd.f32 %v1773_v44, %v1724_v29 }
 0x2cc   : > { %2026 = vperm.xlu1 %2682, %v1956_v45   ;;  %v1911_v38 = vmax.f32 %v1774_v21, 0.0 }
 0x2cd   : > { %1867 = vmatpush.bf16.msra.mxu3 %v1608_v15  ;;  %2036 = vperm.xlu0 %2681, %v1958_v46  }
 0x2ce   : > { %2016 = vperm.xlu2 %2683, %v1954_v0  }
 0x2d1   : > { %1868 = vmatpush.bf16.msra.mxu3 %v1606_v49  ;;  %v1775_v56 = vpop.f32.mrf.mxu1  ;;  %v1729_v60 = vpop.f32.mrf.mxu0 }
 0x2d2   : > { %v1776_v2 = vadd.f32 %v1775_v56, %v1726_v57 }
 0x2d5   : > { %1869 = vmatpush.bf16.msra.mxu3 %v1604_v7 }
 0x2d8   : > { %1870 = vmatmul.bf16.vlgmr.msra.gmra.mxu3 %v3663_v10  ;;  %v1957_v10 = vld [vmem:[%s3980_s3 + $0x70] sm:$0xff] }
 0x2d9   : > { %2031 = vperm.xlu2 %2683, %v1957_v10   ;;  %v1778_v47 = vpop.f32.mrf.mxu1  ;;  %v1731_v31 = vpop.f32.mrf.mxu0 }
 0x2da   : > { %v1779_v20 = vadd.f32 %v1778_v47, %v1729_v60 }
 0x2db   : > { %v1822_v18 = vpop.f32.mrf.mxu2 }
 0x2dc   : > { %v1915_v19 = vmax.f32 %v1779_v20, 0.0 }
 0x2e1   : > { %v1734_v23 = vpop.f32.mrf.mxu0 }
 0x2e3   : > { %v1824_v52 = vpop.f32.mrf.mxu2 }
 0x2e8   : > { %1875 = vmatmul.bf16.gmra.mxu3 %v3689_v36  ;;  %v1780_v36 = vpop.f32.mrf.mxu1 }
 0x2e9   : > { %v1781_v63 = vadd.f32 %v1780_v36, %v1731_v31  ;;  %v1736_v50 = vpop.f32.mrf.mxu0 }
 0x2eb   : > { %v1917_v53 = vmax.f32 %v1781_v63, 0.0  ;;  %v1827_v54 = vpop.f32.mrf.mxu2 }
 0x2f1   : > { %v1739_v34 = vpop.f32.mrf.mxu0 }
 0x2f3   : > { %v1829_v62 = vpop.f32.mrf.mxu2 }
 0x2f8   : > { %1880 = vmatmul.bf16.gmra.mxu3 %v3714_v32  ;;  %v1913_v32 = vmax.f32 %v1776_v2, 0.0 }
 0x2f9   : > { %v1741_v3 = vpop.f32.mrf.mxu0 }
 0x2fb   : > { %v1832_v51 = vpop.f32.mrf.mxu2 }
 0x303   : > { %v3894_v46 = vpop.f32.mrf.mxu2 }
 0x308   : > { %1885 = vmatmul.bf16.gmra.mxu3 %v3739_v16 }
 0x30b   : > { %v3896_v47 = vpop.f32.mrf.mxu2 }
 0x310   : > { %v1982_v28 = vpop.permute.xlu2 %1981 }
 0x317   : > { %v1962_v39 = vpop.permute.xlu0 %1961 }
 0x318   : > { %1890 = vmatmul.bf16.gmra.mxu3 %v3760_v58  ;;  %v2039_v13 = vmul.f32 %v1962_v39, %v1911_v38  ;;  %v1783_v58 = vpop.f32.mrf.mxu1 }
 0x319   : > { %v1784_v22 = vadd.f32 %v1783_v58, %v1734_v23 }
 0x31b   : > { %v1919_v1 = vmax.f32 %v1784_v22, 0.0  ;;  %v3908_v22 = vpop.permute.xlu2 %1986 }
 0x31d   : > { %v2047_v4 = vmul.f32 %v1982_v28, %v1919_v1 }
 0x31e   : > { %v1972_v42 = vpop.permute.xlu1 %1971 }
 0x31f   : > { %v1967_v16 = vpop.permute.xlu0 %1966  ;;  %v2043_v35 = vmul.f32 %v1972_v42, %v1915_v19 }
 0x320   : > { %v2041_v14 = vmul.f32 %v1967_v16, %v1913_v32  ;;  %v1785_v33 = vpop.f32.mrf.mxu1 }
 0x321   : > { %v1786_v63 = vadd.f32 %v1785_v33, %v1736_v50 }
 0x322   : > { %v2071_v61 = vadd.f32 %v2041_v14, %v2039_v13 }
 0x323   : > { %v1921_v13 = vmax.f32 %v1786_v63, 0.0 }
 0x324   : > { %v2072_v5 = vadd.f32 %v2071_v61, %v2043_v35 }
 0x325   : > { %v2049_v1 = vmul.f32 %v3908_v22, %v1921_v13 }
 0x326   : > { %v1977_v40 = vpop.permute.xlu1 %1976 }
 0x328   : > { %1895 = vmatmul.bf16.gmra.mxu3 %v3775_v27  ;;  %v2045_v27 = vmul.f32 %v1977_v40, %v1917_v53  ;;  %v1788_v30 = vpop.f32.mrf.mxu1 }
 0x329   : > { %v1789_v23 = vadd.f32 %v1788_v30, %v1739_v34 }
 0x32a   : > { %v2073_v41 = vadd.f32 %v2072_v5, %v2045_v27  ;;  %v3911_v27 = vpop.permute.xlu0 %1991 }
 0x32b   : > { %v1923_v61 = vmax.f32 %v1789_v23, 0.0 }
 0x32c   : > { %v3891_v17 = vadd.f32 %v2073_v41, %v2047_v4 }
 0x32e   : > { %v2075_v41 = vadd.f32 %v3891_v17, %v2049_v1  ;;  %v3917_v50 = vpop.permute.xlu1 %1996 }
 0x330   : > { %v1790_v25 = vpop.f32.mrf.mxu1 }
 0x338   : > { %1900 = vmatmul.bf16.gmra.mxu3 %v3793_v26  ;;  %v1744_v26 = vpop.f32.mrf.mxu0  ;;  %v1793_v9 = vpop.f32.mrf.mxu1 }
 0x339   : > { %v1794_v4 = vadd.f32 %v1793_v9, %v1744_v26 }
 0x340   : > { %v1746_v43 = vpop.f32.mrf.mxu0  ;;  %v1795_v24 = vpop.f32.mrf.mxu1 }
 0x341   : > { %v1796_v34 = vadd.f32 %v1795_v24, %v1746_v43 }
 0x348   : > { %1905 = vmatmul.bf16.gmra.mxu3 %v3837_v6  ;;  %v1749_v56 = vpop.f32.mrf.mxu0  ;;  %v1798_v31 = vpop.f32.mrf.mxu1 }
 0x350   : > { %v1751_v32 = vpop.f32.mrf.mxu0  ;;  %v1800_v19 = vpop.f32.mrf.mxu1 }
 0x358   : > { %v1754_v53 = vpop.f32.mrf.mxu0  ;;  %v1803_v35 = vpop.f32.mrf.mxu1 }
 0x359   : > { %v1804_v43 = vadd.f32 %v1803_v35, %v1754_v53 }
 0x35b   : > { %v1871_v55 = vpop.f32.mrf.mxu3 }
 0x35c   : > { %v1872_v11 = vadd.f32 %v1871_v55, %v1822_v18  ;;  %v2051_v18 = vmul.f32 %v3911_v27, %v1923_v61 }
 0x35e   : > { %v1912_v15 = vmax.f32 %v1872_v11, 0.0 }
 0x360   : > { %v2040_v49 = vmul.f32 %v1962_v39, %v1912_v15  ;;  %v1805_v55 = vpop.f32.mrf.mxu1 }
 0x363   : > { %v1873_v59 = vpop.f32.mrf.mxu3 }
 0x364   : > { %v1874_v8 = vadd.f32 %v1873_v59, %v1824_v52  ;;  %v1927_v52 = vmax.f32 %v1794_v4, 0.0  ;;  %v1799_v59 = vadd.f32 %v1798_v31, %v1749_v56 }
 0x366   : > { %v1914_v48 = vmax.f32 %v1874_v8, 0.0  ;;  %v3925_v8 = vpop.permute.xlu0 %2006  ;;  %v1931_v26 = vmax.f32 %v1799_v59, 0.0 }
 0x368   : > { %v2042_v37 = vmul.f32 %v1967_v16, %v1914_v48 }
 0x36a   : > { %v2092_v12 = vadd.f32 %v2042_v37, %v2040_v49  ;;  %v3928_v49 = vpop.permute.xlu1 %2011 }
 0x36b   : > { %v1876_v6 = vpop.f32.mrf.mxu3 }
 0x36c   : > { %v1877_v7 = vadd.f32 %v1876_v6, %v1827_v54  ;;  %v2076_v54 = vadd.f32 %v2075_v41, %v2051_v18  ;;  %v1808_v6 = vpop.f32.mrf.mxu1 }
 0x36e   : > { %v1916_v45 = vmax.f32 %v1877_v7, 0.0 }
 0x370   : > { %v2044_v0 = vmul.f32 %v1972_v42, %v1916_v45  ;;  %v3902_v42 = vpop.f32.mrf.mxu2 }
 0x372   : > { %v2093_v10 = vadd.f32 %v2092_v12, %v2044_v0  ;;  %v2059_v0 = vmul.f32 %v3928_v49, %v1931_v26  ;;  %v3936_v31 = vpop.permute.xlu1 %2026 }
 0x373   : > { %v1878_v29 = vpop.f32.mrf.mxu3 }
 0x374   : > { %v1879_v44 = vadd.f32 %v1878_v29, %v1829_v62  ;;  %v3922_v62 = vpop.permute.xlu2 %2001  ;;  %v1935_v29 = vmax.f32 %v1804_v43, 0.0  ;;  %v1810_v63 = vpop.f32.mrf.mxu1 }
 0x375   : > { %v2055_v17 = vmul.f32 %v3922_v62, %v1927_v52 }
 0x376   : > { %v1918_v57 = vmax.f32 %v1879_v44, 0.0 }
 0x378   : > { %v2046_v60 = vmul.f32 %v1977_v40, %v1918_v57  ;;  %v3906_v58 = vpop.f32.mrf.mxu2  ;;  %v1791_v40 = vadd.f32 %v1790_v25, %v1741_v3  ;;  %v1756_v3 = vpop.f32.mrf.mxu0  ;;  %v1929_v25 = vmax.f32 %v1796_v34, 0.0 }
 0x379   : > { %v1806_v44 = vadd.f32 %v1805_v55, %v1756_v3 }
 0x37a   : > { %v2094_v39 = vadd.f32 %v2093_v10, %v2046_v60  ;;  %v2057_v9 = vmul.f32 %v3925_v8, %v1929_v25  ;;  %v3934_v60 = vpop.permute.xlu0 %2021 }
 0x37b   : > { %v1881_v36 = vpop.f32.mrf.mxu3 }
 0x37c   : > { %v1882_v21 = vadd.f32 %v1881_v36, %v1832_v51  ;;  %v1801_v51 = vadd.f32 %v1800_v19, %v1751_v32  ;;  %v3931_v10 = vpop.permute.xlu2 %2016  ;;  %v2063_v32 = vmul.f32 %v3934_v60, %v1935_v29 }
 0x37e   : > { %v1920_v2 = vmax.f32 %v1882_v21, 0.0  ;;  %v1933_v45 = vmax.f32 %v1801_v51, 0.0  ;;  %v1937_v21 = vmax.f32 %v1806_v44, 0.0 }
 0x380   : > { %v2048_v38 = vmul.f32 %v1982_v28, %v1920_v2  ;;  %v1925_v28 = vmax.f32 %v1791_v40, 0.0  ;;  %v3919_v33 = vpop.f32.mrf.mxu2  ;;  %v1759_v12 = vpop.f32.mrf.mxu0  ;;  %v2061_v56 = vmul.f32 %v3931_v10, %v1933_v45  ;;  %v2065_v53 = vmul.f32 %v3936_v31, %v1937_v21 }
 0x382   : > { %v3898_v20 = vadd.f32 %v2094_v39, %v2048_v38  ;;  %v2053_v30 = vmul.f32 %v3917_v50, %v1925_v28  ;;  %v1809_v38 = vadd.f32 %v1808_v6, %v1759_v12  ;;  %v2037_v41 = vpop.permute.xlu0 %2036 }
 0x383   : > { %v3900_v16 = vpop.f32.mrf.mxu3 }
 0x384   : > { %v2077_v15 = vadd.f32 %v2076_v54, %v2053_v30  ;;  %v1939_v13 = vmax.f32 %v1809_v38, 0.0  ;;  %v2032_v61 = vpop.permute.xlu2 %2031  ;;  %v1884_v54 = vadd.f32 %v3900_v16, %v3894_v46 }
 0x386   : > { %v2078_v48 = vadd.f32 %v2077_v15, %v2055_v17  ;;  %v2067_v28 = vmul.f32 %v2032_v61, %v1939_v13  ;;  %v1922_v25 = vmax.f32 %v1884_v54, 0.0 }
 0x388   : > { %v1847_v37 = vpop.f32.mrf.mxu2  ;;  %v2079_v24 = vadd.f32 %v2078_v48, %v2057_v9  ;;  %v1761_v19 = vpop.f32.mrf.mxu0  ;;  %v2050_v12 = vmul.f32 %v3908_v22, %v1922_v25 }
 0x389   : > { %v1811_v35 = vadd.f32 %v1810_v63, %v1761_v19 }
 0x38a   : > { %v2080_v57 = vadd.f32 %v2079_v24, %v2059_v0 }
 0x38b   : > { %v3904_v14 = vpop.f32.mrf.mxu3  ;;  %v1941_v4 = vmax.f32 %v1811_v35, 0.0 }
 0x38c   : > { %v2081_v2 = vadd.f32 %v2080_v57, %v2061_v56  ;;  %v1887_v55 = vadd.f32 %v3904_v14, %v3896_v47 }
 0x38d   : > { %v2069_v34 = vmul.f32 %v2037_v41, %v1941_v4 }
 0x38e   : > { %v2082_v23 = vadd.f32 %v2081_v2, %v2063_v32  ;;  %v1924_v26 = vmax.f32 %v1887_v55, 0.0 }
 0x390   : > { %v1849_v36 = vpop.f32.mrf.mxu2  ;;  %v2083_v1 = vadd.f32 %v2082_v23, %v2065_v53  ;;  %v2052_v47 = vmul.f32 %v3911_v27, %v1924_v26 }
 0x392   : > { %v2084_v52 = vadd.f32 %v2083_v1, %v2067_v28 }
 0x393   : > { %v3913_v5 = vpop.f32.mrf.mxu3 }
 0x394   : > { %v2085_v3 = vadd.f32 %v2084_v52, %v2069_v34  ;;  %v1889_v59 = vadd.f32 %v3913_v5, %v3902_v42  ;;  %v2096_v42 = vadd.f32 %v3898_v20, %v2050_v12 }
 0x396   : > { %v2086_v17 = vrot.slane %v2085_v3, 4  ;;  %v1926_v48 = vmax.f32 %v1889_v59, 0.0 }
 0x398   : > { %v1852_v18 = vpop.f32.mrf.mxu2  ;;  %v2087_v16 = vadd.f32 %v2086_v17, %v2085_v3  ;;  %v2054_v5 = vmul.f32 %v3917_v50, %v1926_v48 }
 0x39a   : > { %v2088_v24 = vrot.slane %v2087_v16, 2 }
 0x39b   : > { %v1891_v11 = vpop.f32.mrf.mxu3 }
 0x39c   : > { %v1892_v51 = vadd.f32 %v1891_v11, %v3906_v58  ;;  %v2097_v11 = vadd.f32 %v2096_v42, %v2052_v47  ;;  %v2089_v27 = vadd.f32 %v2088_v24, %v2087_v16  ;;  %v2157_v42 = vlaneseq }
 0x39e   : > { %v1928_v6 = vmax.f32 %v1892_v51, 0.0  ;;  %v2098_v29 = vadd.f32 %v2097_v11, %v2054_v5  ;;  %v2090_v19 = vrot.slane %v2089_v27, 1  ;;  %vm2159_vm9 = vcmp.lt.s32.totalorder %v2157_v42, 256 }
 0x3a0   : > { %v1854_v15 = vpop.f32.mrf.mxu2  ;;  %v2091_v1 = vadd.f32 %v2090_v19, %v2089_v27 }
 0x3a2   : > { %v2571_v52 = vmul.f32 -1.442695, %v2091_v1 }
 0x3a3   : > { %v1893_v7 = vpop.f32.mrf.mxu3 }
 0x3a4   : > { %v1894_v9 = vadd.f32 %v1893_v7, %v3919_v33  ;;  %v2056_v33 = vmul.f32 %v3922_v62, %v1928_v6  ;;  %2684 = vpow2.f32 %v2571_v52 }
 0x3a6   : > { %v1930_v14 = vmax.f32 %v1894_v9, 0.0 }
 0x3a8   : > { %v1857_v7 = vpop.f32.mrf.mxu2 }
 0x3ab   : > { %v1896_v39 = vpop.f32.mrf.mxu3 }
 0x3ac   : > { %v1897_v45 = vadd.f32 %v1896_v39, %v1847_v37  ;;  %v2058_v37 = vmul.f32 %v3925_v8, %v1930_v14  ;;  %v2099_v39 = vadd.f32 %v2098_v29, %v2056_v33 }
 0x3ae   : > { %v1932_v0 = vmax.f32 %v1897_v45, 0.0  ;;  %v2100_v21 = vadd.f32 %v2099_v39, %v2058_v37 }
 0x3b0   : > { %v2060_v20 = vmul.f32 %v3928_v49, %v1932_v0  ;;  %v1859_v8 = vpop.f32.mrf.mxu2 }
 0x3b2   : > { %v2101_v38 = vadd.f32 %v2100_v21, %v2060_v20 }
 0x3b3   : > { %v1898_v40 = vpop.f32.mrf.mxu3 }
 0x3b4   : > { %v1899_v43 = vadd.f32 %v1898_v40, %v1849_v36 }
 0x3b6   : > { %v1934_v22 = vmax.f32 %v1899_v43, 0.0 }
 0x3b8   : > { %v2062_v2 = vmul.f32 %v3931_v10, %v1934_v22 }
 0x3ba   : > { %v2102_v63 = vadd.f32 %v2101_v38, %v2062_v2 }
 0x3bb   : > { %v1901_v30 = vpop.f32.mrf.mxu3 }
 0x3bc   : > { %v1902_v58 = vadd.f32 %v1901_v30, %v1852_v18  ;;  %v2685_v30 = vpop.eup %2684 }
 0x3be   : > { %v1936_v56 = vmax.f32 %v1902_v58, 0.0 }
 0x3c0   : > { %v2064_v62 = vmul.f32 %v3934_v60, %v1936_v56 }
 0x3c2   : > { %v2103_v53 = vadd.f32 %v2102_v63, %v2064_v62 }
 0x3c3   : > { %v1903_v46 = vpop.f32.mrf.mxu3 }
 0x3c4   : > { %v1904_v44 = vadd.f32 %v1903_v46, %v1854_v15 }
 0x3c6   : > { %v1938_v50 = vmax.f32 %v1904_v44, 0.0 }
 0x3c8   : > { %v2066_v13 = vmul.f32 %v3936_v31, %v1938_v50  ;;  %v2119_v31 = vadd.f32 1.0, %v2685_v30 }
 0x3ca   : > { %v2104_v49 = vadd.f32 %v2103_v53, %v2066_v13  ;;  %2686 = vrcp.f32 %v2119_v31  ;;  %vm2126_vm0 = vweird.f32 %v2119_v31  ;;  %v2130_v46 = vand.u32 2147483647, %v2119_v31 }
 0x3cb   : > { %v1906_v57 = vpop.f32.mrf.mxu3  ;;  %v2132_v16 = vand.u32 2147483648, %v2119_v31 }
 0x3cc   : > { %v1907_v36 = vadd.f32 %v1906_v57, %v1857_v7  ;;  %vm2131_vm6 = vcmp.eq.f32.partialorder %v2130_v46, 8.507059e+37 }
 0x3cd   : > { %v2133_v24 = vor.u32 1.1754944e-38, %v2132_v16 }
 0x3ce   : > { %v1940_v32 = vmax.f32 %v1907_v36, 0.0 }
 0x3d0   : > { %v2068_v40 = vmul.f32 %v2032_v61, %v1940_v32  ;;  %v2687_v61 = vpop.eup %2686 }
 0x3d1   : > { %v2122_v26 = vmul.f32 %v2687_v61, %v2119_v31  ;;  %vm2127_vm1 = vweird.f32 %v2687_v61 }
 0x3d2   : > { %v2105_v4 = vadd.f32 %v2104_v49, %v2068_v40  ;;  %vm3958_vm3 = vmor %vm2126_vm0, %vm2127_vm1 }
 0x3d3   : > { %v1908_v23 = vpop.f32.mrf.mxu3 }
 0x3d4   : > { %v1909_v35 = vadd.f32 %v1908_v23, %v1859_v8 }
 0x3d6   : > { %v1942_v28 = vmax.f32 %v1909_v35, 0.0 }
 0x3d8   : > { %v2070_v18 = vmul.f32 %v2037_v41, %v1942_v28  ;;  %v2123_v41 = vsub.f32 1.0, %v2122_v26 }
 0x3da   : > { %v2106_v10 = vadd.f32 %v2105_v4, %v2070_v18  ;;  %v2124_v48 = vmul.f32 %v2687_v61, %v2123_v41 }
 0x3dc   : > { %v2107_v34 = vrot.slane %v2106_v10, 4  ;;  %v2125_v45 = vadd.f32 %v2687_v61, %v2124_v48 }
 0x3de   : > { %v2108_v54 = vadd.f32 %v2107_v34, %v2106_v10  ;;  %v2129_v58 = vsel %vm3958_vm3, %v2687_v61, %v2125_v45 }
 0x3df   : > { %v2134_v22 = vsel %vm2131_vm6, %v2133_v24, %v2129_v58 }
 0x3e0   : > { %v2109_v60 = vrot.slane %v2108_v54, 2 }
 0x3e2   : > { %v2110_v3 = vadd.f32 %v2109_v60, %v2108_v54 }
 0x3e4   : > { %v2111_v55 = vrot.slane %v2110_v3, 1 }
 0x3e6   : > { %v2112_v25 = vadd.f32 %v2111_v55, %v2110_v3 }
 0x3e8   : > { %v2572_v59 = vmul.f32 -1.442695, %v2112_v25 }
 0x3ea   : > { %2688 = vpow2.f32 %v2572_v59 }
 0x3f0   : > { %v2689_v15 = vpop.eup %2688 }
 0x3f1   : > { %v2120_v17 = vadd.f32 1.0, %v2689_v15 }
 0x3f3   : > { %2690 = vrcp.f32 %v2120_v17  ;;  %v2147_v6 = vand.u32 2147483648, %v2120_v17  ;;  %v2145_v14 = vand.u32 2147483647, %v2120_v17  ;;  %vm2141_vm4 = vweird.f32 %v2120_v17 }
 0x3f5   : > { %v2148_v0 = vor.u32 1.1754944e-38, %v2147_v6  ;;  %vm2146_vm7 = vcmp.eq.f32.partialorder %v2145_v14, 8.507059e+37 }
 0x3f9   : > { %v2691_v51 = vpop.eup %2690 }
 0x3fa   : > { %v2137_v9 = vmul.f32 %v2691_v51, %v2120_v17  ;;  %vm2142_vm2 = vweird.f32 %v2691_v51 }
 0x3fb   : > { %vm2143_vm5 = vmor %vm2141_vm4, %vm2142_vm2 }
 0x3fc   : > { %v2138_v12 = vsub.f32 1.0, %v2137_v9 }
 0x3fe   : > { %v2139_v47 = vmul.f32 %v2691_v51, %v2138_v12 }
 0x400   : > { %v2140_v5 = vadd.f32 %v2691_v51, %v2139_v47 }
 0x402   : > { %v2144_v11 = vsel %vm2143_vm5, %v2691_v51, %v2140_v5 }
 0x403   : > { %v2149_v33 = vsel %vm2146_vm7, %v2148_v0, %v2144_v11 }
 0x404   : > { %v2153_v7 = vrot.slane %v2149_v33, 7 }
 0x406   : > { %v2155_v29 = vsel %vm2154_vm8, %v2134_v22, %v2153_v7 }
 0x407   : > { %2161 = vst.msk [vmem:[%s233_s10] sm:$0x3] %vm2159_vm9, %v2155_v29 }
 0x408 PF: > { %s14_s17 = sadd.s32 1, %s2714_s17   ;;  %s4119_s15 = smov %s2710_s16 }
 0x409   : > { %p11_p5 = scmp.ge.s32.totalorder %s14_s17, 4   ;;  %s4120_s16 = smov %s4122_s18 }
 0x40b   :  { %13 = sbr.rel (!%p11_p5) target bundleno = 2 (0x2), region = 66 }

</bundles_post_ra>
